<compile_context>
chip_gen: v7x
topology: tpu7x:2x2x1
jax: 0.10.0
libtpu: 0.0.40
codegen_flags: <defaults>
</compile_context>

<pallas_src>
import jax
import jax.numpy as jnp
from jax.experimental import pallas as pl
from jax.experimental.pallas import tpu as pltpu


def _conv1x1_kernel(w_ref, x_ref, o_ref):
    # One MXU matmul per C_out block; fp32 accumulation, cast on store.
    o_ref[...] = jnp.dot(
        w_ref[...], x_ref[...], preferred_element_type=jnp.float32
    ).astype(o_ref.dtype)


def conv2d_1x1(x_nchw, weight_oihw):
    """1x1 stride-1 conv, no bias. x: [N, C_in, H, W], weight: [C_out, C_in, 1, 1]."""
    N, C_in, H, W = x_nchw.shape
    C_out = weight_oihw.shape[0]
    assert weight_oihw.shape == (C_out, C_in, 1, 1)

    M = N * H * W

    # Weight [C_out, C_in, 1, 1] -> [C_out, C_in]: pure reshape, no data movement.
    w_ok = weight_oihw.reshape(C_out, C_in)

    # Activations -> [C_in, N*H*W]. For N == 1 (the module's case) this is a
    # pure reshape; general N needs a (small) batch transpose.
    if N == 1:
        x_km = x_nchw.reshape(C_in, M)
    else:
        x_km = jnp.transpose(x_nchw, (1, 0, 2, 3)).reshape(C_in, M)

    # Split C_out so the pipeline can double-buffer the weight stream:
    # 4 blocks -> 4 pipelined steps on 1-TC chips, 2 steps/core on 2-TC chips.
    n_blocks = 1
    for cand in (4, 3, 2):
        if C_out % cand == 0 and (C_out // cand) % 8 == 0:
            n_blocks = cand
            break
    tile_cout = C_out // n_blocks

    flops = 2 * C_out * C_in * M
    bytes_accessed = 4 * (C_out * C_in + C_in * M + C_out * M)

    out_om = pl.pallas_call(
        _conv1x1_kernel,
        out_shape=jax.ShapeDtypeStruct((C_out, M), x_nchw.dtype),
        grid_spec=pltpu.PrefetchScalarGridSpec(
            num_scalar_prefetch=0,
            grid=(n_blocks,),
            in_specs=[
                # Weight rows for this block: changes every step -> pipelined.
                pl.BlockSpec((tile_cout, C_in), lambda j: (j, 0)),
                # All pixels: constant block index -> fetched once.
                pl.BlockSpec((C_in, M), lambda j: (0, 0)),
            ],
            out_specs=pl.BlockSpec((tile_cout, M), lambda j: (j, 0)),
        ),
        compiler_params=pltpu.CompilerParams(
            dimension_semantics=("parallel",),
        ),
        cost_estimate=pl.CostEstimate(
            flops=flops, transcendentals=0, bytes_accessed=bytes_accessed
        ),
    )(w_ok, x_km)

    # [C_out, N*H*W] -> [N, C_out, H, W]; pure reshape for N == 1.
    if N == 1:
        return out_om.reshape(1, C_out, H, W)
    return jnp.transpose(out_om.reshape(C_out, N, H, W), (1, 0, 2, 3))


if __name__ == "__main__":
    key = jax.random.PRNGKey(0)
    kx, kw = jax.random.split(key)

    # Shapes implied by the module's forward pass: x923 = [1, 2304, 7, 7].
    x = jax.random.normal(kx, (1, 2304, 7, 7), dtype=jnp.float32)
    # Deterministic synthetic weight for Conv2d(2304, 384, 1, 1, bias=False).
    w = (jax.random.normal(kw, (384, 2304, 1, 1), dtype=jnp.float32)
         * (1.0 / jnp.sqrt(2304.0)))

    out = conv2d_1x1(x, w)
    out = jax.block_until_ready(out)

    # Sanity check against plain-JAX reference conv.
    ref = jax.lax.conv_general_dilated(
        x, w, window_strides=(1, 1), padding="VALID",
        dimension_numbers=("NCHW", "OIHW", "NCHW"),
    )
    assert out.shape == (1, 384, 7, 7), out.shape
    assert jnp.allclose(out, ref, atol=1e-3, rtol=1e-3)

    print("KERNEL_OK")
</pallas_src>

<mosaic_0001>
module attributes {stable_mosaic.version = 11 : i64} {
  func.func @_conv1x1_kernel(%arg0: i32, %arg1: memref<96x2304xf32, #tpu.memory_space<vmem>>, %arg2: memref<2304x49xf32, #tpu.memory_space<vmem>>, %arg3: memref<96x49xf32, #tpu.memory_space<vmem>>) attributes {dimension_semantics = [#tpu.dimension_semantics<parallel>], iteration_bounds = array<i64: 4>, scalar_prefetch = 0 : i64, scratch_operands = 0 : i64, tpu.core_type = #tpu.core_type<tc>, window_params = [{transform_indices = @transform_0, window_bounds = array<i64: 96, 2304>}, {pipeline_mode = #tpu.pipeline_mode<synchronous>, transform_indices = @transform_1, window_bounds = array<i64: 2304, 49>}, {transform_indices = @transform_2, window_bounds = array<i64: 96, 49>}]} {
    %c0 = arith.constant 0 : index
    %c0_0 = arith.constant 0 : index
    %0 = vector.load %arg1[%c0, %c0_0] : memref<96x2304xf32, #tpu.memory_space<vmem>>, vector<96x2304xf32>
    %c0_1 = arith.constant 0 : index
    %c0_2 = arith.constant 0 : index
    %1 = vector.load %arg2[%c0_1, %c0_2] : memref<2304x49xf32, #tpu.memory_space<vmem>>, vector<2304x49xf32>
    %cst = arith.constant dense<0.000000e+00> : vector<96x49xf32>
    %2 = tpu.matmul %0, %1, %cst {dimension_numbers = #tpu.dot_dimension_numbers<[1], [0], [0], [1], [0, 0, 1, 1], [], []>} : vector<96x2304xf32>, vector<2304x49xf32>, vector<96x49xf32> -> vector<96x49xf32>
    %c0_3 = arith.constant 0 : index
    %c0_4 = arith.constant 0 : index
    %3 = vector.load %arg3[%c0_3, %c0_4] : memref<96x49xf32, #tpu.memory_space<vmem>>, vector<96x49xf32>
    tpu.vector_store %arg3[%c0_3, %c0_4], %2 {strides = array<i32>} : memref<96x49xf32, #tpu.memory_space<vmem>>, vector<96x49xf32>,
    return
  }
  func.func @transform_0(%arg0: i32) -> (i32, i32) {
    %c0_i32 = arith.constant 0 : i32
    %c0_i32_0 = arith.constant 0 : i32
    return %arg0, %c0_i32 : i32, i32
  }
  func.func @transform_1(%arg0: i32) -> (i32, i32) {
    %c0_i32 = arith.constant 0 : i32
    %c0_i32_0 = arith.constant 0 : i32
    %c0_i32_1 = arith.constant 0 : i32
    return %c0_i32, %c0_i32_0 : i32, i32
  }
  func.func @transform_2(%arg0: i32) -> (i32, i32) {
    %c0_i32 = arith.constant 0 : i32
    %c0_i32_0 = arith.constant 0 : i32
    return %arg0, %c0_i32 : i32, i32
  }
}

</mosaic_0001>

<bundles_post_ra>
// kernel: tpu_custom_call.1
= control target key start
LH: loop header
LB: loop body
LE: loop exit
PB: predicated region body
PF: predicated region fallthrough
CT: control target
= control target key end

     0   :  { %7 = vsyncpa [#allocation3], 0  ;;  %s4269_s0 = inlined_call_operand.hbm [shape: f32[384,2304], index: 0, kind: input, shape index: {}]   ;;  %s4270_s1 = inlined_call_operand.vmem [shape: f32[2304,49], index: 1, kind: input, shape index: {}]   ;;  %s4271_s2 = inlined_call_operand.vmem [shape: f32[384,49], index: 2, kind: output, shape index: {}]  }
   0x1   :  { %9 = vsyncpa [#allocation3 + $0x1], 0  ;;  %s2930_s9 = smov 0   ;;  %s2932_s10 = smov 0  }
   0x2   :  { %s2934_s11 = smov 0   ;;  %s2936_s12 = smov 0  }
   0x3 LB: > { %s1876_s13 = sadd.s32 4294967295, %s2910_s12   ;;  %s2950_s14 = sadd.s32 1, %s2910_s12   ;;  %s2910_s12 = sphi %s2936_s12, %s4277_s12   ;;  %s2906_s11 = sphi %s2934_s11, %s4276_s11   ;;  %s2902_s10 = sphi %s2932_s10, %s4275_s10   ;;  %s2898_s9 = sphi %s2930_s9, %s4274_s9  }
   0x4   : > { %s19_s15 = ssub.s32 %s2910_s12, %s2950_s14  ;;  %s22_s16 = sadd.s32 1, %s2906_s11 }
   0x5   : > { %p20_p0 = scmp.eq.s32.totalorder %s19_s15, 0  ;;  %p29_p1 = scmp.ne.s32.totalorder %s2906_s11, %s2902_s10 }
   0x6   : > { %p30_p2 = scmp.eq.s32.totalorder %s2910_s12, 0  ;;  %p35_p3 = scmp.ne.s32.totalorder %s2902_s10, %s2898_s9 }
   0x7   : > { %s2960_s17 = scalar_select %p20_p0, %s2906_s11, %s22_s16  }
   0x8   : > { %p31_p4 = por %p30_p2, %p29_p1  ;;  %p36_p5 = scmp.eq.s32.totalorder %s1876_s13, 0 }
   0x9   : > { %p2810_p6 = scmp.lt.s32.totalorder %s2910_s12, 4  ;;  %s109_s19 = sand.u32 1, %s2906_s11  }
   0xa   : > { %p2965_p7 = por %p36_p5, %p35_p3  ;;  %s2801_s20 = smul.u32 1728, %s109_s19 }
   0xb   : > { %p2970_p8 = pnand %p2810_p6, %p31_p4  ;;  %s2811_s22 = smul.u32 27648, %s2910_s12 }
   0xc   : > { %s113_s23 = scalar_lea.vmem [#allocation2], %s2801_s20  ;;  %s2982_s28 = scalar_lea.sflag [#allocation3], %s109_s19 }
   0xd   : > { %s121_s24 = sshll.u32 %s113_s23, 4  ;;  %s2978_s27 = scalar_lea.hbm %s4269_s0, %s2811_s22  ;;  %s2980_s24 = int_to_ptr.vmem [resolvable:$true] %s121_s24 }
   0xe   : > { %s2846_s29 = scalar_lea.hbm %s2978_s27, 27648  ;;  %p2848_p10 = pneg %p2970_p8 }
   0xf   : > { %p2847_p9 = scmp.ne.s32.totalorder %s2978_s27, %s2846_s29  ;;  %s2851_s4 = scalar_lea.hbm %s4269_s0, 110592 }
  0x10   : > { %p2852_p13 = scmp.lt.u32.totalorder %s2978_s27, %s4269_s0  ;;  %p2853_p0 = scmp.lt.u32.totalorder %s2851_s4, %s2846_s29 }
  0x11   : > { %p2849_p11 = pnand %p2848_p10, %p2847_p9  ;;  %p2855_p2 = scmp.lt.u32.totalorder %s2846_s29, %s2978_s27 }
  0x12   : > { %p2854_p1 = por %p2853_p0, %p2852_p13 }
  0x13   : > { %p2850_p12 = pneg %p2849_p11 }
  0x14   : > { %p2856_p3 = por %p2855_p2, %p2854_p1 }
  0x16   : > { %p2857_p4 = pnand %p2856_p3, %p2850_p12 }
  0x18   : > { %2860 = shalt.err (!%p2857_p4)
}
  0x19   : > { %s2861_s7 = scalar_lea.vmem %s2980_s24, 27648  ;;  %s2912_s8 = smov [#allocation2]  }
  0x1a   : > { %p2862_p5 = scmp.ne.s32.totalorder %s2980_s24, %s2861_s7  ;;  %s2866_s9 = sshll.u32 %s2912_s8, 4  ;;  %s2867_s9 = int_to_ptr.vmem [resolvable:$false] %s2866_s9 }
  0x1b   : > { %s2868_s15 = scalar_lea.vmem %s2867_s9, 55296  ;;  %p2869_p11 = scmp.lt.s32.totalorder %s2980_s24, %s2867_s9 }
  0x1c   : > { %p2864_p6 = pnand %p2862_p5, %p2848_p10  ;;  %p2870_p13 = scmp.lt.s32.totalorder %s2868_s15, %s2861_s7 }
  0x1e   : > { %p2865_p9 = pneg %p2864_p6  ;;  %p2871_p0 = por %p2870_p13, %p2869_p11 }
  0x20   : > { %p2872_p1 = pnand %p2871_p0, %p2865_p9 }
  0x22   : > { %2875 = shalt.err (!%p2872_p1)
}
  0x23   : > { %s2913_s16 = smov 2304   ;;  %s2914_s19 = smov 144  }
  0x24   : > { %2809 = dma.hbm_to_vmem [thread:$0]  (!%p2970_p8), %s2978_s27, 27648, %s2980_s24, %s2982_s28, %s2913_s16, %s2913_s16, %s2914_s19  }
  0x25   : > { %p1881_p10 = scmp.ge.s32.totalorder %s2910_s12, 1  ;;  %p129_p12 = scmp.lt.s32.totalorder %s2910_s12, 5 }
  0x27   : > { %p130_p2 = pnand %p1881_p10, %p129_p12 }
  0x28   : > { %s135_s20 = sand.u32 (!%p130_p2), 1, %s2902_s10  }
  0x29   : > { %133 = sbr.rel (%p130_p2) target bundleno = 516 (0x204), region = 28  ;;  %s136_s23 = scalar_lea.sflag (!%p130_p2), [#allocation3], %s135_s20 }
  0x2a   : > { %s2803_s22 = smul.u32 (!%p130_p2), 1728, %s135_s20 }
  0x2c   : > { %s3013_s25 = scalar_lea.vmem (!%p130_p2), [#allocation2], %s2803_s22 }
  0x30   : > { %2893 = dma.done.wait (%p2965_p7), %s136_s23, 27648  }
  0x31   : > { %2895 = vsyncadd (%p2965_p7), %s136_s23, 4294939648  ;;  %v399_v0 = vld [vmem:[%s4270_s1 + $0x80] sm:$0xff]  ;;  %v400_v1 = vld [vmem:[%s4270_s1 + $0x88] sm:$0xff]  ;;  %vm1796_vm0 = vcmask 400384  }
  0x32   : > { %v431_v2 = vld [vmem:[%s4270_s1 + $0x180] sm:$0xff]  ;;  %v2497_v3 = vpack.c.bf16 %v400_v1, %v399_v0  ;;  %v432_v4 = vld [vmem:[%s4270_s1 + $0x188] sm:$0xff]  ;;  %v401_v11 = vld [vmem:[%s4270_s1 + $0x90] sm:$0xff] }
  0x33   : > { %v383_v5 = vld [vmem:[%s4270_s1] sm:$0xff]  ;;  %v384_v6 = vld [vmem:[%s4270_s1 + $0x8] sm:$0xff]  ;;  %v2529_v7 = vpack.c.bf16 %v432_v4, %v431_v2  ;;  %v402_v13 = vld [vmem:[%s4270_s1 + $0x98] sm:$0xff] }
  0x34   : > { %v2499_v8 = vpack.c.bf16 %v384_v6, %v383_v5  ;;  %v415_v9 = vld [vmem:[%s4270_s1 + $0x100] sm:$0xff]  ;;  %v416_v10 = vld [vmem:[%s4270_s1 + $0x108] sm:$0xff]  ;;  %2498 = vmatprep.subr.bf16.mxu0 %v2497_v3  ;;  %v433_v14 = vld [vmem:[%s4270_s1 + $0x190] sm:$0xff]  ;;  %v2501_v16 = vpack.c.bf16 %v402_v13, %v401_v11 }
  0x35   : > { %v2531_v12 = vpack.c.bf16 %v416_v10, %v415_v9  ;;  %v434_v15 = vld [vmem:[%s4270_s1 + $0x198] sm:$0xff]  ;;  %2530 = vmatprep.subr.bf16.mxu1 %v2529_v7  ;;  %v385_v18 = vld [vmem:[%s4270_s1 + $0x10] sm:$0xff]  ;;  %v403_v23 = vld [vmem:[%s4270_s1 + $0xa0] sm:$0xff] }
  0x36   : > { %2500 = vmatpush3.bf16.msra.mxu0 %v2499_v8  ;;  %v2533_v17 = vpack.c.bf16 %v434_v15, %v433_v14  ;;  %v386_v19 = vld [vmem:[%s4270_s1 + $0x18] sm:$0xff]  ;;  %v417_v20 = vld [vmem:[%s4270_s1 + $0x110] sm:$0xff]  ;;  %v404_v24 = vld [vmem:[%s4270_s1 + $0xa8] sm:$0xff] }
  0x37   : > { %2532 = vmatpush3.bf16.msra.mxu1 %v2531_v12  ;;  %v2503_v21 = vpack.c.bf16 %v386_v19, %v385_v18  ;;  %v418_v22 = vld [vmem:[%s4270_s1 + $0x118] sm:$0xff]  ;;  %2502 = vmatprep.subr.bf16.mxu0 %v2501_v16  ;;  %v2505_v26 = vpack.c.bf16 %v404_v24, %v403_v23  ;;  %v435_v27 = vld [vmem:[%s4270_s1 + $0x1a0] sm:$0xff]  ;;  %v436_v28 = vld [vmem:[%s4270_s1 + $0x1a8] sm:$0xff] }
  0x38   : > { %2534 = vmatprep.subr.bf16.mxu1 %v2533_v17  ;;  %v2535_v25 = vpack.c.bf16 %v418_v22, %v417_v20  ;;  %v387_v29 = vld [vmem:[%s4270_s1 + $0x20] sm:$0xff]  ;;  %v2537_v30 = vpack.c.bf16 %v436_v28, %v435_v27  ;;  %v388_v31 = vld [vmem:[%s4270_s1 + $0x28] sm:$0xff]  ;;  %v405_v35 = vld [vmem:[%s4270_s1 + $0xb0] sm:$0xff] }
  0x39   : > { %v419_v32 = vld [vmem:[%s4270_s1 + $0x120] sm:$0xff]  ;;  %v420_v33 = vld [vmem:[%s4270_s1 + $0x128] sm:$0xff]  ;;  %v2507_v34 = vpack.c.bf16 %v388_v31, %v387_v29  ;;  %v406_v36 = vld [vmem:[%s4270_s1 + $0xb8] sm:$0xff] }
  0x3a   : > { %2504 = vmatpush3.bf16.msra.mxu0 %v2503_v21  ;;  %v437_v37 = vld [vmem:[%s4270_s1 + $0x1b0] sm:$0xff]  ;;  %v2539_v38 = vpack.c.bf16 %v420_v33, %v419_v32  ;;  %v2509_v39 = vpack.c.bf16 %v406_v36, %v405_v35  ;;  %v438_v40 = vld [vmem:[%s4270_s1 + $0x1b8] sm:$0xff]  ;;  %v407_v46 = vld [vmem:[%s4270_s1 + $0xc0] sm:$0xff] }
  0x3b   : > { %2536 = vmatpush3.bf16.msra.mxu1 %v2535_v25  ;;  %2506 = vmatprep.subr.bf16.mxu0 %v2505_v26  ;;  %v389_v41 = vld [vmem:[%s4270_s1 + $0x30] sm:$0xff]  ;;  %v390_v42 = vld [vmem:[%s4270_s1 + $0x38] sm:$0xff]  ;;  %v2541_v43 = vpack.c.bf16 %v438_v40, %v437_v37  ;;  %v408_v47 = vld [vmem:[%s4270_s1 + $0xc8] sm:$0xff] }
  0x3c   : > { %2538 = vmatprep.subr.bf16.mxu1 %v2537_v30  ;;  %v421_v44 = vld [vmem:[%s4270_s1 + $0x130] sm:$0xff]  ;;  %v422_v45 = vld [vmem:[%s4270_s1 + $0x138] sm:$0xff]  ;;  %v439_v48 = vld [vmem:[%s4270_s1 + $0x1c0] sm:$0xff]  ;;  %v2511_v50 = vpack.c.bf16 %v390_v42, %v389_v41  ;;  %v2513_v52 = vpack.c.bf16 %v408_v47, %v407_v46 }
  0x3d   : > { %v440_v49 = vld [vmem:[%s4270_s1 + $0x1c8] sm:$0xff]  ;;  %v2543_v51 = vpack.c.bf16 %v422_v45, %v421_v44  ;;  %v391_v53 = vld [vmem:[%s4270_s1 + $0x40] sm:$0xff]  ;;  %v409_v58 = vld [vmem:[%s4270_s1 + $0xd0] sm:$0xff] }
  0x3e   : > { %2508 = vmatpush3.bf16.msra.mxu0 %v2507_v34  ;;  %v392_v54 = vld [vmem:[%s4270_s1 + $0x48] sm:$0xff]  ;;  %v423_v55 = vld [vmem:[%s4270_s1 + $0x140] sm:$0xff]  ;;  %v2545_v56 = vpack.c.bf16 %v440_v49, %v439_v48  ;;  %v410_v59 = vld [vmem:[%s4270_s1 + $0xd8] sm:$0xff] }
  0x3f   : > { %2540 = vmatpush3.bf16.msra.mxu1 %v2539_v38  ;;  %2510 = vmatprep.subr.bf16.mxu0 %v2509_v39  ;;  %v424_v57 = vld [vmem:[%s4270_s1 + $0x148] sm:$0xff]  ;;  %v441_v60 = vld [vmem:[%s4270_s1 + $0x1d0] sm:$0xff]  ;;  %v442_v61 = vld [vmem:[%s4270_s1 + $0x1d8] sm:$0xff]  ;;  %v2515_v62 = vpack.c.bf16 %v392_v54, %v391_v53  ;;  %v2517_v0 = vpack.c.bf16 %v410_v59, %v409_v58 }
  0x40   : > { %2542 = vmatprep.subr.bf16.mxu1 %v2541_v43  ;;  %v2547_v63 = vpack.c.bf16 %v424_v57, %v423_v55  ;;  %v393_v1 = vld [vmem:[%s4270_s1 + $0x50] sm:$0xff]  ;;  %v394_v2 = vld [vmem:[%s4270_s1 + $0x58] sm:$0xff]  ;;  %v2549_v4 = vpack.c.bf16 %v442_v61, %v441_v60  ;;  %v411_v6 = vld [vmem:[%s4270_s1 + $0xe0] sm:$0xff] }
  0x41   : > { %v425_v3 = vld [vmem:[%s4270_s1 + $0x150] sm:$0xff]  ;;  %v426_v5 = vld [vmem:[%s4270_s1 + $0x158] sm:$0xff]  ;;  %v412_v7 = vld [vmem:[%s4270_s1 + $0xe8] sm:$0xff]  ;;  %v2519_v10 = vpack.c.bf16 %v394_v2, %v393_v1 }
  0x42   : > { %2512 = vmatpush3.bf16.msra.mxu0 %v2511_v50  ;;  %v443_v8 = vld [vmem:[%s4270_s1 + $0x1e0] sm:$0xff]  ;;  %v444_v9 = vld [vmem:[%s4270_s1 + $0x1e8] sm:$0xff]  ;;  %v2551_v13 = vpack.c.bf16 %v426_v5, %v425_v3  ;;  %v2521_v14 = vpack.c.bf16 %v412_v7, %v411_v6  ;;  %v170_v17 = vld [vmem:[%s3013_s25 + $0x18] sm:$0xff] }
  0x43   : > { %2544 = vmatpush3.bf16.msra.mxu1 %v2543_v51  ;;  %2514 = vmatprep.subr.bf16.mxu0 %v2513_v52  ;;  %v395_v11 = vld [vmem:[%s4270_s1 + $0x60] sm:$0xff]  ;;  %v396_v12 = vld [vmem:[%s4270_s1 + $0x68] sm:$0xff]  ;;  %v2553_v18 = vpack.c.bf16 %v444_v9, %v443_v8  ;;  %v413_v20 = vld [vmem:[%s4270_s1 + $0xf0] sm:$0xff] }
  0x44   : > { %2546 = vmatprep.subr.bf16.mxu1 %v2545_v56  ;;  %v427_v15 = vld [vmem:[%s4270_s1 + $0x160] sm:$0xff]  ;;  %v168_v16 = vld [vmem:[%s3013_s25 + $0x8] sm:$0xff]  ;;  %v414_v21 = vld [vmem:[%s4270_s1 + $0xf8] sm:$0xff]  ;;  %860 = vmatprep.mubr.f32.mxu1 %v170_v17  ;;  %v2523_v24 = vpack.c.bf16 %v396_v12, %v395_v11 }
  0x45   : > { %v428_v19 = vld [vmem:[%s4270_s1 + $0x168] sm:$0xff]  ;;  %735 = vmatprep.mubr.f32.mxu0 %v168_v16  ;;  %v445_v22 = vld [vmem:[%s4270_s1 + $0x1f0] sm:$0xff]  ;;  %v446_v23 = vld [vmem:[%s4270_s1 + $0x1f8] sm:$0xff]  ;;  %v2525_v26 = vpack.c.bf16 %v414_v21, %v413_v20 }
  0x46   : > { %2516 = vmatpush3.bf16.msra.mxu0 %v2515_v62  ;;  %v2555_v25 = vpack.c.bf16 %v428_v19, %v427_v15  ;;  %v397_v27 = vld [vmem:[%s4270_s1 + $0x70] sm:$0xff]  ;;  %v398_v28 = vld [vmem:[%s4270_s1 + $0x78] sm:$0xff]  ;;  %v2557_v30 = vpack.c.bf16 %v446_v23, %v445_v22  ;;  %v463_v32 = vld [vmem:[%s4270_s1 + $0x280] sm:$0xff] }
  0x47   : > { %2548 = vmatpush3.bf16.msra.mxu1 %v2547_v63  ;;  %2518 = vmatprep.subr.bf16.mxu0 %v2517_v0  ;;  %v429_v29 = vld [vmem:[%s4270_s1 + $0x170] sm:$0xff]  ;;  %v430_v31 = vld [vmem:[%s4270_s1 + $0x178] sm:$0xff]  ;;  %v464_v33 = vld [vmem:[%s4270_s1 + $0x288] sm:$0xff]  ;;  %v2527_v36 = vpack.c.bf16 %v398_v28, %v397_v27 }
  0x48   : > { %2550 = vmatprep.subr.bf16.mxu1 %v2549_v4  ;;  %v495_v34 = vld [vmem:[%s4270_s1 + $0x380] sm:$0xff]  ;;  %v496_v35 = vld [vmem:[%s4270_s1 + $0x388] sm:$0xff]  ;;  %v2559_v37 = vpack.c.bf16 %v430_v31, %v429_v29  ;;  %v2561_v38 = vpack.c.bf16 %v464_v33, %v463_v32  ;;  %v465_v44 = vld [vmem:[%s4270_s1 + $0x290] sm:$0xff] }
  0x49   : > { %v447_v39 = vld [vmem:[%s4270_s1 + $0x200] sm:$0xff]  ;;  %v448_v40 = vld [vmem:[%s4270_s1 + $0x208] sm:$0xff]  ;;  %v2593_v41 = vpack.c.bf16 %v496_v35, %v495_v34  ;;  %v466_v45 = vld [vmem:[%s4270_s1 + $0x298] sm:$0xff] }
  0x4a   : > { %2520 = vmatpush3.bf16.msra.mxu0 %v2519_v10  ;;  %v479_v42 = vld [vmem:[%s4270_s1 + $0x300] sm:$0xff]  ;;  %v480_v43 = vld [vmem:[%s4270_s1 + $0x308] sm:$0xff]  ;;  %v2563_v47 = vpack.c.bf16 %v448_v40, %v447_v39  ;;  %v497_v48 = vld [vmem:[%s4270_s1 + $0x390] sm:$0xff]  ;;  %v2565_v54 = vpack.c.bf16 %v466_v45, %v465_v44 }
  0x4b   : > { %2552 = vmatpush3.bf16.msra.mxu1 %v2551_v13  ;;  %2522 = vmatprep.subr.bf16.mxu0 %v2521_v14  ;;  %v167_v46 = vld [vmem:[%s3013_s25] sm:$0xff]  ;;  %v498_v49 = vld [vmem:[%s4270_s1 + $0x398] sm:$0xff]  ;;  %v169_v50 = vld [vmem:[%s3013_s25 + $0x10] sm:$0xff]  ;;  %v2595_v51 = vpack.c.bf16 %v480_v43, %v479_v42 }
  0x4c   : > { %2554 = vmatprep.subr.bf16.mxu1 %v2553_v18  ;;  %v186_v52 = vld [vmem:[%s3013_s25 + $0x98] sm:$0xff]  ;;  %v188_v53 = vld [vmem:[%s3013_s25 + $0xa8] sm:$0xff]  ;;  %v449_v55 = vld [vmem:[%s4270_s1 + $0x210] sm:$0xff]  ;;  %v2597_v58 = vpack.c.bf16 %v498_v49, %v497_v48 }
  0x4d   : > { %v450_v56 = vld [vmem:[%s4270_s1 + $0x218] sm:$0xff]  ;;  %v481_v57 = vld [vmem:[%s4270_s1 + $0x310] sm:$0xff]  ;;  %v467_v60 = vld [vmem:[%s4270_s1 + $0x2a0] sm:$0xff] }
  0x4e   : > { %2524 = vmatpush3.bf16.msra.mxu0 %v2523_v24  ;;  %v482_v59 = vld [vmem:[%s4270_s1 + $0x318] sm:$0xff]  ;;  %v468_v61 = vld [vmem:[%s4270_s1 + $0x2a8] sm:$0xff]  ;;  %v185_v62 = vld [vmem:[%s3013_s25 + $0x90] sm:$0xff]  ;;  %v2567_v4 = vpack.c.bf16 %v450_v56, %v449_v55 }
  0x4f   : > { %2556 = vmatpush3.bf16.msra.mxu1 %v2555_v25  ;;  %2526 = vmatprep.subr.bf16.mxu0 %v2525_v26  ;;  %v499_v63 = vld [vmem:[%s4270_s1 + $0x3a0] sm:$0xff]  ;;  %v500_v0 = vld [vmem:[%s4270_s1 + $0x3a8] sm:$0xff]  ;;  %v206_v3 = vld [vmem:[%s3013_s25 + $0x138] sm:$0xff]  ;;  %v2599_v5 = vpack.c.bf16 %v482_v59, %v481_v57  ;;  %v2569_v6 = vpack.c.bf16 %v468_v61, %v467_v60 }
  0x50   : > { %2558 = vmatprep.subr.bf16.mxu1 %v2557_v30  ;;  %v187_v1 = vld [vmem:[%s3013_s25 + $0xa0] sm:$0xff]  ;;  %v204_v2 = vld [vmem:[%s3013_s25 + $0x128] sm:$0xff]  ;;  %v2601_v10 = vpack.c.bf16 %v500_v0, %v499_v63  ;;  %v469_v12 = vld [vmem:[%s4270_s1 + $0x2b0] sm:$0xff] }
  0x51   : > { %v451_v7 = vld [vmem:[%s4270_s1 + $0x220] sm:$0xff]  ;;  %v452_v8 = vld [vmem:[%s4270_s1 + $0x228] sm:$0xff]  ;;  %v470_v13 = vld [vmem:[%s4270_s1 + $0x2b8] sm:$0xff] }
  0x52   : > { %2528 = vmatpush3.bf16.msra.mxu0 %v2527_v36  ;;  %v483_v9 = vld [vmem:[%s4270_s1 + $0x320] sm:$0xff]  ;;  %v484_v11 = vld [vmem:[%s4270_s1 + $0x328] sm:$0xff]  ;;  %v501_v15 = vld [vmem:[%s4270_s1 + $0x3b0] sm:$0xff]  ;;  %v2571_v20 = vpack.c.bf16 %v452_v8, %v451_v7  ;;  %v2573_v22 = vpack.c.bf16 %v470_v13, %v469_v12 }
  0x53   : > { %2560 = vmatpush3.bf16.msra.mxu1 %v2559_v37  ;;  %2562 = vmatprep.subr.bf16.mxu0 %v2561_v38  ;;  %v203_v14 = vld [vmem:[%s3013_s25 + $0x120] sm:$0xff]  ;;  %v502_v16 = vld [vmem:[%s4270_s1 + $0x3b8] sm:$0xff]  ;;  %v205_v17 = vld [vmem:[%s3013_s25 + $0x130] sm:$0xff]  ;;  %v2603_v21 = vpack.c.bf16 %v484_v11, %v483_v9 }
  0x54   : > { %2594 = vmatprep.subr.bf16.mxu1 %v2593_v41  ;;  %v222_v18 = vld [vmem:[%s3013_s25 + $0x1b8] sm:$0xff]  ;;  %v224_v19 = vld [vmem:[%s3013_s25 + $0x1c8] sm:$0xff]  ;;  %v453_v23 = vld [vmem:[%s4270_s1 + $0x230] sm:$0xff]  ;;  %v2605_v26 = vpack.c.bf16 %v502_v16, %v501_v15 }
  0x55   : > { %736 = vmatmul.mubr.f32.vlgmr.msra.gmra.mrb[0].mxu0 %v167_v46  ;;  %v454_v24 = vld [vmem:[%s4270_s1 + $0x238] sm:$0xff]  ;;  %v485_v25 = vld [vmem:[%s4270_s1 + $0x330] sm:$0xff]  ;;  %v471_v28 = vld [vmem:[%s4270_s1 + $0x2c0] sm:$0xff] }
  0x56   : > { %861 = vmatmul.mubr.f32.vlgmr.msra.gmra.mrb[0].mxu1 %v169_v50  ;;  %2564 = vmatpush3.bf16.msra.mxu0 %v2563_v47  ;;  %v486_v27 = vld [vmem:[%s4270_s1 + $0x338] sm:$0xff]  ;;  %v472_v29 = vld [vmem:[%s4270_s1 + $0x2c8] sm:$0xff]  ;;  %v221_v30 = vld [vmem:[%s3013_s25 + $0x1b0] sm:$0xff]  ;;  %v2575_v36 = vpack.c.bf16 %v454_v24, %v453_v23 }
  0x57   : > { %2596 = vmatpush3.bf16.msra.mxu1 %v2595_v51  ;;  %740 = vmatprep.mubr.f32.mxu0 %v186_v52  ;;  %v503_v31 = vld [vmem:[%s4270_s1 + $0x3c0] sm:$0xff]  ;;  %v504_v32 = vld [vmem:[%s4270_s1 + $0x3c8] sm:$0xff]  ;;  %v242_v35 = vld [vmem:[%s3013_s25 + $0x258] sm:$0xff]  ;;  %v2607_v37 = vpack.c.bf16 %v486_v27, %v485_v25  ;;  %v2577_v38 = vpack.c.bf16 %v472_v29, %v471_v28 }
  0x58   : > { %865 = vmatprep.mubr.f32.mxu1 %v188_v53  ;;  %2566 = vmatprep.subr.bf16.mxu0 %v2565_v54  ;;  %v223_v33 = vld [vmem:[%s3013_s25 + $0x1c0] sm:$0xff]  ;;  %v240_v34 = vld [vmem:[%s3013_s25 + $0x248] sm:$0xff]  ;;  %v2609_v42 = vpack.c.bf16 %v504_v32, %v503_v31  ;;  %v473_v44 = vld [vmem:[%s4270_s1 + $0x2d0] sm:$0xff] }
  0x59   : > { %741 = vmatmul.mubr.f32.gmra.mrb[2].mxu0 %v185_v62  ;;  %2598 = vmatprep.subr.bf16.mxu1 %v2597_v58  ;;  %v455_v39 = vld [vmem:[%s4270_s1 + $0x240] sm:$0xff]  ;;  %v456_v40 = vld [vmem:[%s4270_s1 + $0x248] sm:$0xff]  ;;  %v474_v45 = vld [vmem:[%s4270_s1 + $0x2d8] sm:$0xff] }
  0x5a   : > { %866 = vmatmul.mubr.f32.gmra.mrb[2].mxu1 %v187_v1  ;;  %745 = vmatprep.mubr.f32.mxu0 %v204_v2  ;;  %v487_v41 = vld [vmem:[%s4270_s1 + $0x340] sm:$0xff]  ;;  %v488_v43 = vld [vmem:[%s4270_s1 + $0x348] sm:$0xff]  ;;  %v505_v47 = vld [vmem:[%s4270_s1 + $0x3d0] sm:$0xff]  ;;  %v2579_v52 = vpack.c.bf16 %v456_v40, %v455_v39  ;;  %v2581_v54 = vpack.c.bf16 %v474_v45, %v473_v44 }
  0x5b   : > { %870 = vmatprep.mubr.f32.mxu1 %v206_v3  ;;  %2568 = vmatpush3.bf16.msra.mxu0 %v2567_v4  ;;  %v239_v46 = vld [vmem:[%s3013_s25 + $0x240] sm:$0xff]  ;;  %v506_v48 = vld [vmem:[%s4270_s1 + $0x3d8] sm:$0xff]  ;;  %v241_v49 = vld [vmem:[%s3013_s25 + $0x250] sm:$0xff]  ;;  %v2611_v53 = vpack.c.bf16 %v488_v43, %v487_v41 }
  0x5c   : > { %2600 = vmatpush3.bf16.msra.mxu1 %v2599_v5  ;;  %2570 = vmatprep.subr.bf16.mxu0 %v2569_v6  ;;  %v258_v50 = vld [vmem:[%s3013_s25 + $0x2d8] sm:$0xff]  ;;  %v260_v51 = vld [vmem:[%s3013_s25 + $0x2e8] sm:$0xff]  ;;  %v457_v55 = vld [vmem:[%s4270_s1 + $0x250] sm:$0xff]  ;;  %v2613_v58 = vpack.c.bf16 %v506_v48, %v505_v47 }
  0x5d   : > { %746 = vmatmul.mubr.f32.gmra.mrb[4].mxu0 %v203_v14  ;;  %2602 = vmatprep.subr.bf16.mxu1 %v2601_v10  ;;  %v458_v56 = vld [vmem:[%s4270_s1 + $0x258] sm:$0xff]  ;;  %v489_v57 = vld [vmem:[%s4270_s1 + $0x350] sm:$0xff]  ;;  %v475_v60 = vld [vmem:[%s4270_s1 + $0x2e0] sm:$0xff] }
  0x5e   : > { %871 = vmatmul.mubr.f32.gmra.mrb[4].mxu1 %v205_v17  ;;  %750 = vmatprep.mubr.f32.mxu0 %v222_v18  ;;  %v490_v59 = vld [vmem:[%s4270_s1 + $0x358] sm:$0xff]  ;;  %v476_v61 = vld [vmem:[%s4270_s1 + $0x2e8] sm:$0xff]  ;;  %v257_v62 = vld [vmem:[%s3013_s25 + $0x2d0] sm:$0xff]  ;;  %v2583_v4 = vpack.c.bf16 %v458_v56, %v457_v55 }
  0x5f   : > { %875 = vmatprep.mubr.f32.mxu1 %v224_v19  ;;  %2572 = vmatpush3.bf16.msra.mxu0 %v2571_v20  ;;  %v507_v63 = vld [vmem:[%s4270_s1 + $0x3e0] sm:$0xff]  ;;  %v508_v0 = vld [vmem:[%s4270_s1 + $0x3e8] sm:$0xff]  ;;  %v278_v3 = vld [vmem:[%s3013_s25 + $0x378] sm:$0xff]  ;;  %v2615_v5 = vpack.c.bf16 %v490_v59, %v489_v57  ;;  %v2585_v6 = vpack.c.bf16 %v476_v61, %v475_v60 }
  0x60   : > { %2604 = vmatpush3.bf16.msra.mxu1 %v2603_v21  ;;  %2574 = vmatprep.subr.bf16.mxu0 %v2573_v22  ;;  %v259_v1 = vld [vmem:[%s3013_s25 + $0x2e0] sm:$0xff]  ;;  %v276_v2 = vld [vmem:[%s3013_s25 + $0x368] sm:$0xff]  ;;  %v2617_v10 = vpack.c.bf16 %v508_v0, %v507_v63  ;;  %v477_v12 = vld [vmem:[%s4270_s1 + $0x2f0] sm:$0xff] }
  0x61   : > { %751 = vmatmul.mubr.f32.gmra.mrb[6].mxu0 %v221_v30  ;;  %2606 = vmatprep.subr.bf16.mxu1 %v2605_v26  ;;  %v459_v7 = vld [vmem:[%s4270_s1 + $0x260] sm:$0xff]  ;;  %v460_v8 = vld [vmem:[%s4270_s1 + $0x268] sm:$0xff]  ;;  %v478_v13 = vld [vmem:[%s4270_s1 + $0x2f8] sm:$0xff] }
  0x62   : > { %876 = vmatmul.mubr.f32.gmra.mrb[6].mxu1 %v223_v33  ;;  %755 = vmatprep.mubr.f32.mxu0 %v240_v34  ;;  %v491_v9 = vld [vmem:[%s4270_s1 + $0x360] sm:$0xff]  ;;  %v492_v11 = vld [vmem:[%s4270_s1 + $0x368] sm:$0xff]  ;;  %v509_v15 = vld [vmem:[%s4270_s1 + $0x3f0] sm:$0xff]  ;;  %v2587_v19 = vpack.c.bf16 %v460_v8, %v459_v7  ;;  %v2589_v22 = vpack.c.bf16 %v478_v13, %v477_v12 }
  0x63   : > { %880 = vmatprep.mubr.f32.mxu1 %v242_v35  ;;  %2576 = vmatpush3.bf16.msra.mxu0 %v2575_v36  ;;  %v275_v14 = vld [vmem:[%s3013_s25 + $0x360] sm:$0xff]  ;;  %v510_v16 = vld [vmem:[%s4270_s1 + $0x3f8] sm:$0xff]  ;;  %v277_v17 = vld [vmem:[%s3013_s25 + $0x370] sm:$0xff]  ;;  %v2619_v21 = vpack.c.bf16 %v492_v11, %v491_v9 }
  0x64   : > { %2608 = vmatpush3.bf16.msra.mxu1 %v2607_v37  ;;  %2578 = vmatprep.subr.bf16.mxu0 %v2577_v38  ;;  %v294_v18 = vld [vmem:[%s3013_s25 + $0x3f8] sm:$0xff]  ;;  %v296_v20 = vld [vmem:[%s3013_s25 + $0x408] sm:$0xff]  ;;  %v461_v23 = vld [vmem:[%s4270_s1 + $0x270] sm:$0xff]  ;;  %v2621_v26 = vpack.c.bf16 %v510_v16, %v509_v15 }
  0x65   : > { %756 = vmatmul.mubr.f32.gmra.mrb[8].mxu0 %v239_v46  ;;  %2610 = vmatprep.subr.bf16.mxu1 %v2609_v42  ;;  %v462_v24 = vld [vmem:[%s4270_s1 + $0x278] sm:$0xff]  ;;  %v293_v25 = vld [vmem:[%s3013_s25 + $0x3f0] sm:$0xff]  ;;  %v527_v29 = vld [vmem:[%s4270_s1 + $0x480] sm:$0xff] }
  0x66   : > { %881 = vmatmul.mubr.f32.gmra.mrb[8].mxu1 %v241_v49  ;;  %760 = vmatprep.mubr.f32.mxu0 %v258_v50  ;;  %v493_v27 = vld [vmem:[%s4270_s1 + $0x370] sm:$0xff]  ;;  %v494_v28 = vld [vmem:[%s4270_s1 + $0x378] sm:$0xff]  ;;  %v528_v30 = vld [vmem:[%s4270_s1 + $0x488] sm:$0xff]  ;;  %v2591_v34 = vpack.c.bf16 %v462_v24, %v461_v23 }
  0x67   : > { %885 = vmatprep.mubr.f32.mxu1 %v260_v51  ;;  %2580 = vmatpush3.bf16.msra.mxu0 %v2579_v52  ;;  %v559_v31 = vld [vmem:[%s4270_s1 + $0x580] sm:$0xff]  ;;  %v312_v33 = vld [vmem:[%s3013_s25 + $0x488] sm:$0xff]  ;;  %v314_v36 = vld [vmem:[%s3013_s25 + $0x498] sm:$0xff]  ;;  %v2623_v37 = vpack.c.bf16 %v494_v28, %v493_v27  ;;  %v2625_v38 = vpack.c.bf16 %v528_v30, %v527_v29 }
  0x68   : > { %2612 = vmatpush3.bf16.msra.mxu1 %v2611_v53  ;;  %2582 = vmatprep.subr.bf16.mxu0 %v2581_v54  ;;  %v295_v32 = vld [vmem:[%s3013_s25 + $0x400] sm:$0xff]  ;;  %v560_v35 = vld [vmem:[%s4270_s1 + $0x588] sm:$0xff]  ;;  %v313_v41 = vld [vmem:[%s3013_s25 + $0x490] sm:$0xff] }
  0x69   : > { %761 = vmatmul.mubr.f32.gmra.mrb[10].mxu0 %v257_v62  ;;  %2614 = vmatprep.subr.bf16.mxu1 %v2613_v58  ;;  %v2657_v39 = vpack.c.bf16 %v560_v35, %v559_v31  ;;  %v311_v40 = vld [vmem:[%s3013_s25 + $0x480] sm:$0xff]  ;;  %v330_v42 = vld [vmem:[%s3013_s25 + $0x518] sm:$0xff]  ;;  %v332_v43 = vld [vmem:[%s3013_s25 + $0x528] sm:$0xff] }
  0x6a   : > { %886 = vmatmul.mubr.f32.gmra.mrb[10].mxu1 %v259_v1  ;;  %765 = vmatprep.mubr.f32.mxu0 %v276_v2  ;;  %v329_v44 = vld [vmem:[%s3013_s25 + $0x510] sm:$0xff]  ;;  %v331_v45 = vld [vmem:[%s3013_s25 + $0x520] sm:$0xff]  ;;  %v348_v46 = vld [vmem:[%s3013_s25 + $0x5a8] sm:$0xff] }
  0x6b   : > { %890 = vmatprep.mubr.f32.mxu1 %v278_v3  ;;  %2584 = vmatpush3.bf16.msra.mxu0 %v2583_v4  ;;  %v350_v47 = vld [vmem:[%s3013_s25 + $0x5b8] sm:$0xff]  ;;  %v347_v48 = vld [vmem:[%s3013_s25 + $0x5a0] sm:$0xff]  ;;  %v349_v49 = vld [vmem:[%s3013_s25 + $0x5b0] sm:$0xff] }
  0x6c   : > { %2616 = vmatpush3.bf16.msra.mxu1 %v2615_v5  ;;  %2586 = vmatprep.subr.bf16.mxu0 %v2585_v6  ;;  %v366_v50 = vld [vmem:[%s3013_s25 + $0x638] sm:$0xff]  ;;  %v368_v51 = vld [vmem:[%s3013_s25 + $0x648] sm:$0xff]  ;;  %v365_v52 = vld [vmem:[%s3013_s25 + $0x630] sm:$0xff] }
  0x6d   : > { %766 = vmatmul.mubr.f32.gmra.mrb[12].mxu0 %v275_v14  ;;  %2618 = vmatprep.subr.bf16.mxu1 %v2617_v10  ;;  %v367_v53 = vld [vmem:[%s3013_s25 + $0x640] sm:$0xff]  ;;  %v172_v54 = vld [vmem:[%s3013_s25 + $0x28] sm:$0xff]  ;;  %v174_v57 = vld [vmem:[%s3013_s25 + $0x38] sm:$0xff] }
  0x6e   : > { %891 = vmatmul.mubr.f32.gmra.mrb[12].mxu1 %v277_v17  ;;  %770 = vmatprep.mubr.f32.mxu0 %v294_v18  ;;  %v511_v55 = vld [vmem:[%s4270_s1 + $0x400] sm:$0xff]  ;;  %v512_v56 = vld [vmem:[%s4270_s1 + $0x408] sm:$0xff]  ;;  %v529_v60 = vld [vmem:[%s4270_s1 + $0x490] sm:$0xff] }
  0x6f   : > { %895 = vmatprep.mubr.f32.mxu1 %v296_v20  ;;  %2588 = vmatpush3.bf16.msra.mxu0 %v2587_v19  ;;  %v543_v58 = vld [vmem:[%s4270_s1 + $0x500] sm:$0xff]  ;;  %v544_v59 = vld [vmem:[%s4270_s1 + $0x508] sm:$0xff]  ;;  %v530_v61 = vld [vmem:[%s4270_s1 + $0x498] sm:$0xff]  ;;  %v2627_v63 = vpack.c.bf16 %v512_v56, %v511_v55 }
  0x70   : > { %2620 = vmatpush3.bf16.msra.mxu1 %v2619_v21  ;;  %2590 = vmatprep.subr.bf16.mxu0 %v2589_v22  ;;  %v171_v62 = vld [vmem:[%s3013_s25 + $0x20] sm:$0xff]  ;;  %v561_v0 = vld [vmem:[%s4270_s1 + $0x590] sm:$0xff]  ;;  %v562_v1 = vld [vmem:[%s4270_s1 + $0x598] sm:$0xff]  ;;  %v2659_v3 = vpack.c.bf16 %v544_v59, %v543_v58  ;;  %v2629_v6 = vpack.c.bf16 %v530_v61, %v529_v60 }
  0x71   : > { %771 = vmatmul.mubr.f32.gmra.mrb[14].mxu0 %v293_v25  ;;  %2622 = vmatprep.subr.bf16.mxu1 %v2621_v26  ;;  %v173_v2 = vld [vmem:[%s3013_s25 + $0x30] sm:$0xff]  ;;  %v190_v4 = vld [vmem:[%s3013_s25 + $0xb8] sm:$0xff]  ;;  %v192_v5 = vld [vmem:[%s3013_s25 + $0xc8] sm:$0xff]  ;;  %v2661_v10 = vpack.c.bf16 %v562_v1, %v561_v0 }
  0x72   : > { %896 = vmatmul.mubr.f32.gmra.mrb[14].mxu1 %v295_v32  ;;  %775 = vmatprep.mubr.f32.mxu0 %v312_v33  ;;  %v513_v7 = vld [vmem:[%s4270_s1 + $0x410] sm:$0xff]  ;;  %v514_v8 = vld [vmem:[%s4270_s1 + $0x418] sm:$0xff]  ;;  %v531_v12 = vld [vmem:[%s4270_s1 + $0x4a0] sm:$0xff] }
  0x73   : > { %900 = vmatprep.mubr.f32.mxu1 %v314_v36  ;;  %2592 = vmatpush3.bf16.msra.mxu0 %v2591_v34  ;;  %v545_v9 = vld [vmem:[%s4270_s1 + $0x510] sm:$0xff]  ;;  %v546_v11 = vld [vmem:[%s4270_s1 + $0x518] sm:$0xff]  ;;  %v532_v13 = vld [vmem:[%s4270_s1 + $0x4a8] sm:$0xff]  ;;  %v2631_v20 = vpack.c.bf16 %v514_v8, %v513_v7 }
  0x74   : > { %2624 = vmatpush3.bf16.msra.mxu1 %v2623_v37  ;;  %2626 = vmatprep.subr.bf16.mxu0 %v2625_v38  ;;  %v189_v14 = vld [vmem:[%s3013_s25 + $0xb0] sm:$0xff]  ;;  %v563_v15 = vld [vmem:[%s4270_s1 + $0x5a0] sm:$0xff]  ;;  %v564_v16 = vld [vmem:[%s4270_s1 + $0x5a8] sm:$0xff]  ;;  %v2663_v21 = vpack.c.bf16 %v546_v11, %v545_v9  ;;  %v2633_v22 = vpack.c.bf16 %v532_v13, %v531_v12 }
  0x75   : > { %776 = vmatmul.mubr.f32.gmra.mrb[16].mxu0 %v311_v40  ;;  %2658 = vmatprep.subr.bf16.mxu1 %v2657_v39  ;;  %v191_v17 = vld [vmem:[%s3013_s25 + $0xc0] sm:$0xff]  ;;  %v208_v18 = vld [vmem:[%s3013_s25 + $0x148] sm:$0xff]  ;;  %v210_v19 = vld [vmem:[%s3013_s25 + $0x158] sm:$0xff]  ;;  %v2665_v26 = vpack.c.bf16 %v564_v16, %v563_v15 }
  0x76   : > { %901 = vmatmul.mubr.f32.gmra.mrb[16].mxu1 %v313_v41  ;;  %780 = vmatprep.mubr.f32.mxu0 %v330_v42  ;;  %v515_v23 = vld [vmem:[%s4270_s1 + $0x420] sm:$0xff]  ;;  %v516_v24 = vld [vmem:[%s4270_s1 + $0x428] sm:$0xff]  ;;  %v533_v28 = vld [vmem:[%s4270_s1 + $0x4b0] sm:$0xff] }
  0x77   : > { %905 = vmatprep.mubr.f32.mxu1 %v332_v43  ;;  %v547_v25 = vld [vmem:[%s4270_s1 + $0x520] sm:$0xff]  ;;  %v548_v27 = vld [vmem:[%s4270_s1 + $0x528] sm:$0xff]  ;;  %v534_v29 = vld [vmem:[%s4270_s1 + $0x4b8] sm:$0xff]  ;;  %v2635_v36 = vpack.c.bf16 %v516_v24, %v515_v23 }
  0x78   : > { %v207_v30 = vld [vmem:[%s3013_s25 + $0x140] sm:$0xff]  ;;  %v565_v31 = vld [vmem:[%s4270_s1 + $0x5b0] sm:$0xff]  ;;  %v566_v32 = vld [vmem:[%s4270_s1 + $0x5b8] sm:$0xff]  ;;  %v2667_v37 = vpack.c.bf16 %v548_v27, %v547_v25  ;;  %v2637_v38 = vpack.c.bf16 %v534_v29, %v533_v28 }
  0x79   : > { %781 = vmatmul.mubr.f32.gmra.mrb[18].mxu0 %v329_v44  ;;  %v209_v33 = vld [vmem:[%s3013_s25 + $0x150] sm:$0xff]  ;;  %v226_v34 = vld [vmem:[%s3013_s25 + $0x1d8] sm:$0xff]  ;;  %v228_v35 = vld [vmem:[%s3013_s25 + $0x1e8] sm:$0xff]  ;;  %v2669_v42 = vpack.c.bf16 %v566_v32, %v565_v31 }
  0x7a   : > { %906 = vmatmul.mubr.f32.gmra.mrb[18].mxu1 %v331_v45  ;;  %785 = vmatprep.mubr.f32.mxu0 %v348_v46  ;;  %v517_v39 = vld [vmem:[%s4270_s1 + $0x430] sm:$0xff]  ;;  %v518_v40 = vld [vmem:[%s4270_s1 + $0x438] sm:$0xff]  ;;  %v535_v44 = vld [vmem:[%s4270_s1 + $0x4c0] sm:$0xff] }
  0x7b   : > { %910 = vmatprep.mubr.f32.mxu1 %v350_v47  ;;  %v549_v41 = vld [vmem:[%s4270_s1 + $0x530] sm:$0xff]  ;;  %v550_v43 = vld [vmem:[%s4270_s1 + $0x538] sm:$0xff]  ;;  %v536_v45 = vld [vmem:[%s4270_s1 + $0x4c8] sm:$0xff] }
  0x7c   : > { %v225_v46 = vld [vmem:[%s3013_s25 + $0x1d0] sm:$0xff]  ;;  %v567_v47 = vld [vmem:[%s4270_s1 + $0x5c0] sm:$0xff]  ;;  %v520_v56 = vld [vmem:[%s4270_s1 + $0x448] sm:$0xff] }
  0x7d   : > { %786 = vmatmul.mubr.f32.gmra.mrb[20].mxu0 %v347_v48  ;;  %v568_v48 = vld [vmem:[%s4270_s1 + $0x5c8] sm:$0xff]  ;;  %v519_v55 = vld [vmem:[%s4270_s1 + $0x440] sm:$0xff]  ;;  %v537_v60 = vld [vmem:[%s4270_s1 + $0x4d0] sm:$0xff] }
  0x7e   : > { %911 = vmatmul.mubr.f32.gmra.mrb[20].mxu1 %v349_v49  ;;  %790 = vmatprep.mubr.f32.mxu0 %v366_v50  ;;  %v227_v49 = vld [vmem:[%s3013_s25 + $0x1e0] sm:$0xff]  ;;  %v244_v50 = vld [vmem:[%s3013_s25 + $0x268] sm:$0xff]  ;;  %v2673_v58 = vpack.c.bf16 %v568_v48, %v567_v47  ;;  %v538_v61 = vld [vmem:[%s4270_s1 + $0x4d8] sm:$0xff] }
  0x7f   : > { %915 = vmatprep.mubr.f32.mxu1 %v368_v51  ;;  %v246_v51 = vld [vmem:[%s3013_s25 + $0x278] sm:$0xff]  ;;  %v552_v59 = vld [vmem:[%s4270_s1 + $0x548] sm:$0xff]  ;;  %v245_v1 = vld [vmem:[%s3013_s25 + $0x270] sm:$0xff] }
  0x80   : > { %v570_v0 = vld [vmem:[%s4270_s1 + $0x5d8] sm:$0xff]  ;;  %v521_v7 = vld [vmem:[%s4270_s1 + $0x450] sm:$0xff]  ;;  %v539_v12 = vld [vmem:[%s4270_s1 + $0x4e0] sm:$0xff] }
  0x81   : > { %791 = vmatmul.mubr.f32.gmra.mrb[22].mxu0 %v365_v52  ;;  %v2639_v52 = vpack.c.bf16 %v518_v40, %v517_v39  ;;  %v522_v8 = vld [vmem:[%s4270_s1 + $0x458] sm:$0xff]  ;;  %v553_v9 = vld [vmem:[%s4270_s1 + $0x550] sm:$0xff]  ;;  %v540_v13 = vld [vmem:[%s4270_s1 + $0x4e8] sm:$0xff] }
  0x82   : > { %916 = vmatmul.mubr.f32.gmra.mrb[22].mxu1 %v367_v53  ;;  %985 = vmatprep.mubr.f32.mxu0 %v172_v54  ;;  %v2671_v53 = vpack.c.bf16 %v550_v43, %v549_v41  ;;  %v2641_v54 = vpack.c.bf16 %v536_v45, %v535_v44  ;;  %v554_v11 = vld [vmem:[%s4270_s1 + $0x558] sm:$0xff]  ;;  %v571_v15 = vld [vmem:[%s4270_s1 + $0x5e0] sm:$0xff]  ;;  %v572_v16 = vld [vmem:[%s4270_s1 + $0x5e8] sm:$0xff] }
  0x83   : > { %1110 = vmatprep.mubr.f32.mxu1 %v174_v57  ;;  %v551_v57 = vld [vmem:[%s4270_s1 + $0x540] sm:$0xff]  ;;  %v524_v24 = vld [vmem:[%s4270_s1 + $0x468] sm:$0xff]  ;;  %v541_v28 = vld [vmem:[%s4270_s1 + $0x4f0] sm:$0xff] }
  0x84   : > { %v523_v23 = vld [vmem:[%s4270_s1 + $0x460] sm:$0xff]  ;;  %v556_v27 = vld [vmem:[%s4270_s1 + $0x568] sm:$0xff]  ;;  %v542_v29 = vld [vmem:[%s4270_s1 + $0x4f8] sm:$0xff] }
  0x85   : > { %986 = vmatmul.mubr.f32.vlgmr.msra.gmra.mrb[24].mxu0 %v171_v62  ;;  %v243_v62 = vld [vmem:[%s3013_s25 + $0x260] sm:$0xff]  ;;  %v573_v31 = vld [vmem:[%s4270_s1 + $0x5f0] sm:$0xff]  ;;  %v574_v32 = vld [vmem:[%s4270_s1 + $0x5f8] sm:$0xff] }
  0x86   : > { %1111 = vmatmul.mubr.f32.vlgmr.msra.gmra.mrb[24].mxu1 %v173_v2  ;;  %2628 = vmatpush3.bf16.msra.mxu0 %v2627_v63  ;;  %v569_v63 = vld [vmem:[%s4270_s1 + $0x5d0] sm:$0xff]  ;;  %v262_v2 = vld [vmem:[%s3013_s25 + $0x2f8] sm:$0xff]  ;;  %v555_v25 = vld [vmem:[%s4270_s1 + $0x560] sm:$0xff] }
  0x87   : > { %2660 = vmatpush3.bf16.msra.mxu1 %v2659_v3  ;;  %990 = vmatprep.mubr.f32.mxu0 %v190_v4  ;;  %v264_v3 = vld [vmem:[%s3013_s25 + $0x308] sm:$0xff]  ;;  %v2643_v4 = vpack.c.bf16 %v520_v56, %v519_v55  ;;  %v525_v39 = vld [vmem:[%s4270_s1 + $0x470] sm:$0xff]  ;;  %v526_v40 = vld [vmem:[%s4270_s1 + $0x478] sm:$0xff] }
  0x88   : > { %1115 = vmatprep.mubr.f32.mxu1 %v192_v5  ;;  %2630 = vmatprep.subr.bf16.mxu0 %v2629_v6  ;;  %v2675_v5 = vpack.c.bf16 %v552_v59, %v551_v57  ;;  %v2645_v6 = vpack.c.bf16 %v538_v61, %v537_v60  ;;  %v557_v41 = vld [vmem:[%s4270_s1 + $0x570] sm:$0xff]  ;;  %v558_v43 = vld [vmem:[%s4270_s1 + $0x578] sm:$0xff]  ;;  %v591_v44 = vld [vmem:[%s4270_s1 + $0x680] sm:$0xff] }
  0x89   : > { %991 = vmatmul.mubr.f32.gmra.mrb[26].mxu0 %v189_v14  ;;  %2662 = vmatprep.subr.bf16.mxu1 %v2661_v10  ;;  %v2677_v10 = vpack.c.bf16 %v570_v0, %v569_v63  ;;  %v261_v14 = vld [vmem:[%s3013_s25 + $0x2f0] sm:$0xff]  ;;  %v592_v45 = vld [vmem:[%s4270_s1 + $0x688] sm:$0xff]  ;;  %v623_v47 = vld [vmem:[%s4270_s1 + $0x780] sm:$0xff] }
  0x8a   : > { %1116 = vmatmul.mubr.f32.gmra.mrb[26].mxu1 %v191_v17  ;;  %995 = vmatprep.mubr.f32.mxu0 %v208_v18  ;;  %v263_v17 = vld [vmem:[%s3013_s25 + $0x300] sm:$0xff]  ;;  %v280_v18 = vld [vmem:[%s3013_s25 + $0x388] sm:$0xff]  ;;  %v317_v57 = vld [vmem:[%s3013_s25 + $0x4b0] sm:$0xff] }
  0x8b   : > { %1120 = vmatprep.mubr.f32.mxu1 %v210_v19  ;;  %2632 = vmatpush3.bf16.msra.mxu0 %v2631_v20  ;;  %v282_v19 = vld [vmem:[%s3013_s25 + $0x398] sm:$0xff]  ;;  %v2647_v20 = vpack.c.bf16 %v522_v8, %v521_v7  ;;  %v624_v48 = vld [vmem:[%s4270_s1 + $0x788] sm:$0xff]  ;;  %v315_v56 = vld [vmem:[%s3013_s25 + $0x4a0] sm:$0xff] }
  0x8c   : > { %2664 = vmatpush3.bf16.msra.mxu1 %v2663_v21  ;;  %2634 = vmatprep.subr.bf16.mxu0 %v2633_v22  ;;  %v2679_v21 = vpack.c.bf16 %v554_v11, %v553_v9  ;;  %v2649_v22 = vpack.c.bf16 %v540_v13, %v539_v12  ;;  %v2721_v55 = vpack.c.bf16 %v624_v48, %v623_v47  ;;  %v336_v59 = vld [vmem:[%s3013_s25 + $0x548] sm:$0xff]  ;;  %v333_v60 = vld [vmem:[%s3013_s25 + $0x530] sm:$0xff]  ;;  %v335_v61 = vld [vmem:[%s3013_s25 + $0x540] sm:$0xff] }
  0x8d   : > { %996 = vmatmul.mubr.f32.gmra.mrb[28].mxu0 %v207_v30  ;;  %2666 = vmatprep.subr.bf16.mxu1 %v2665_v26  ;;  %v2681_v26 = vpack.c.bf16 %v572_v16, %v571_v15  ;;  %v279_v30 = vld [vmem:[%s3013_s25 + $0x380] sm:$0xff]  ;;  %v354_v63 = vld [vmem:[%s3013_s25 + $0x5d8] sm:$0xff]  ;;  %v576_v8 = vld [vmem:[%s4270_s1 + $0x608] sm:$0xff] }
  0x8e   : > { %1121 = vmatmul.mubr.f32.gmra.mrb[28].mxu1 %v209_v33  ;;  %1000 = vmatprep.mubr.f32.mxu0 %v226_v34  ;;  %v281_v33 = vld [vmem:[%s3013_s25 + $0x390] sm:$0xff]  ;;  %v298_v34 = vld [vmem:[%s3013_s25 + $0x418] sm:$0xff]  ;;  %v351_v0 = vld [vmem:[%s3013_s25 + $0x5c0] sm:$0xff] }
  0x8f   : > { %1125 = vmatprep.mubr.f32.mxu1 %v228_v35  ;;  %2636 = vmatpush3.bf16.msra.mxu0 %v2635_v36  ;;  %v300_v35 = vld [vmem:[%s3013_s25 + $0x428] sm:$0xff]  ;;  %v2651_v36 = vpack.c.bf16 %v524_v24, %v523_v23  ;;  %v575_v7 = vld [vmem:[%s4270_s1 + $0x600] sm:$0xff]  ;;  %v178_v9 = vld [vmem:[%s3013_s25 + $0x58] sm:$0xff] }
  0x90   : > { %2668 = vmatpush3.bf16.msra.mxu1 %v2667_v37  ;;  %2638 = vmatprep.subr.bf16.mxu0 %v2637_v38  ;;  %v2683_v37 = vpack.c.bf16 %v556_v27, %v555_v25  ;;  %v2653_v38 = vpack.c.bf16 %v542_v29, %v541_v28  ;;  %v608_v11 = vld [vmem:[%s4270_s1 + $0x708] sm:$0xff]  ;;  %v593_v12 = vld [vmem:[%s4270_s1 + $0x690] sm:$0xff]  ;;  %v594_v13 = vld [vmem:[%s4270_s1 + $0x698] sm:$0xff]  ;;  %v2691_v15 = vpack.c.bf16 %v576_v8, %v575_v7 }
  0x91   : > { %1001 = vmatmul.mubr.f32.gmra.mrb[30].mxu0 %v225_v46  ;;  %2670 = vmatprep.subr.bf16.mxu1 %v2669_v42  ;;  %v2685_v42 = vpack.c.bf16 %v574_v32, %v573_v31  ;;  %v297_v46 = vld [vmem:[%s3013_s25 + $0x410] sm:$0xff]  ;;  %v578_v24 = vld [vmem:[%s4270_s1 + $0x618] sm:$0xff]  ;;  %v595_v28 = vld [vmem:[%s4270_s1 + $0x6a0] sm:$0xff] }
  0x92   : > { %1126 = vmatmul.mubr.f32.gmra.mrb[30].mxu1 %v227_v49  ;;  %1005 = vmatprep.mubr.f32.mxu0 %v244_v50  ;;  %v299_v49 = vld [vmem:[%s3013_s25 + $0x420] sm:$0xff]  ;;  %v316_v50 = vld [vmem:[%s3013_s25 + $0x4a8] sm:$0xff]  ;;  %v625_v16 = vld [vmem:[%s4270_s1 + $0x790] sm:$0xff] }
  0x93   : > { %1130 = vmatprep.mubr.f32.mxu1 %v246_v51  ;;  %2640 = vmatpush3.bf16.msra.mxu0 %v2639_v52  ;;  %v2655_v51 = vpack.c.bf16 %v526_v40, %v525_v39  ;;  %v318_v52 = vld [vmem:[%s3013_s25 + $0x4b8] sm:$0xff]  ;;  %v577_v23 = vld [vmem:[%s4270_s1 + $0x610] sm:$0xff]  ;;  %v596_v29 = vld [vmem:[%s4270_s1 + $0x6a8] sm:$0xff] }
  0x94   : > { %2672 = vmatpush3.bf16.msra.mxu1 %v2671_v53  ;;  %2642 = vmatprep.subr.bf16.mxu0 %v2641_v54  ;;  %v2687_v53 = vpack.c.bf16 %v558_v43, %v557_v41  ;;  %v2689_v54 = vpack.c.bf16 %v592_v45, %v591_v44  ;;  %v609_v25 = vld [vmem:[%s4270_s1 + $0x710] sm:$0xff]  ;;  %v610_v27 = vld [vmem:[%s4270_s1 + $0x718] sm:$0xff]  ;;  %v627_v31 = vld [vmem:[%s4270_s1 + $0x7a0] sm:$0xff] }
  0x95   : > { %1006 = vmatmul.mubr.f32.gmra.mrb[32].mxu0 %v243_v62  ;;  %2674 = vmatprep.subr.bf16.mxu1 %v2673_v58  ;;  %v334_v58 = vld [vmem:[%s3013_s25 + $0x538] sm:$0xff]  ;;  %v352_v62 = vld [vmem:[%s3013_s25 + $0x5c8] sm:$0xff]  ;;  %v579_v39 = vld [vmem:[%s4270_s1 + $0x620] sm:$0xff] }
  0x96   : > { %1131 = vmatmul.mubr.f32.gmra.mrb[32].mxu1 %v245_v1  ;;  %1010 = vmatprep.mubr.f32.mxu0 %v262_v2  ;;  %v353_v1 = vld [vmem:[%s3013_s25 + $0x5d0] sm:$0xff]  ;;  %v370_v2 = vld [vmem:[%s3013_s25 + $0x658] sm:$0xff]  ;;  %v628_v32 = vld [vmem:[%s4270_s1 + $0x7a8] sm:$0xff] }
  0x97   : > { %1135 = vmatprep.mubr.f32.mxu1 %v264_v3  ;;  %2644 = vmatpush3.bf16.msra.mxu0 %v2643_v4  ;;  %v372_v3 = vld [vmem:[%s3013_s25 + $0x668] sm:$0xff]  ;;  %v369_v4 = vld [vmem:[%s3013_s25 + $0x650] sm:$0xff]  ;;  %v611_v41 = vld [vmem:[%s4270_s1 + $0x720] sm:$0xff] }
  0x98   : > { %2676 = vmatpush3.bf16.msra.mxu1 %v2675_v5  ;;  %2646 = vmatprep.subr.bf16.mxu0 %v2645_v6  ;;  %v371_v5 = vld [vmem:[%s3013_s25 + $0x660] sm:$0xff]  ;;  %v176_v6 = vld [vmem:[%s3013_s25 + $0x48] sm:$0xff]  ;;  %v597_v44 = vld [vmem:[%s4270_s1 + $0x6b0] sm:$0xff] }
  0x99   : > { %1011 = vmatmul.mubr.f32.gmra.mrb[34].mxu0 %v261_v14  ;;  %2678 = vmatprep.subr.bf16.mxu1 %v2677_v10  ;;  %v607_v10 = vld [vmem:[%s4270_s1 + $0x700] sm:$0xff]  ;;  %v580_v40 = vld [vmem:[%s4270_s1 + $0x628] sm:$0xff]  ;;  %v598_v45 = vld [vmem:[%s4270_s1 + $0x6b8] sm:$0xff] }
  0x9a   : > { %1136 = vmatmul.mubr.f32.gmra.mrb[34].mxu1 %v263_v17  ;;  %1015 = vmatprep.mubr.f32.mxu0 %v280_v18  ;;  %v175_v14 = vld [vmem:[%s3013_s25 + $0x40] sm:$0xff]  ;;  %v626_v17 = vld [vmem:[%s4270_s1 + $0x798] sm:$0xff]  ;;  %v177_v18 = vld [vmem:[%s3013_s25 + $0x50] sm:$0xff] }
  0x9b   : > { %1140 = vmatprep.mubr.f32.mxu1 %v282_v19  ;;  %2648 = vmatpush3.bf16.msra.mxu0 %v2647_v20  ;;  %v2723_v19 = vpack.c.bf16 %v608_v11, %v607_v10  ;;  %v194_v20 = vld [vmem:[%s3013_s25 + $0xd8] sm:$0xff]  ;;  %v612_v43 = vld [vmem:[%s4270_s1 + $0x728] sm:$0xff]  ;;  %v629_v47 = vld [vmem:[%s4270_s1 + $0x7b0] sm:$0xff] }
  0x9c   : > { %2680 = vmatpush3.bf16.msra.mxu1 %v2679_v21  ;;  %2650 = vmatprep.subr.bf16.mxu0 %v2649_v22  ;;  %v196_v21 = vld [vmem:[%s3013_s25 + $0xe8] sm:$0xff]  ;;  %v2693_v22 = vpack.c.bf16 %v594_v13, %v593_v12  ;;  %v630_v48 = vld [vmem:[%s4270_s1 + $0x7b8] sm:$0xff]  ;;  %v583_v7 = vld [vmem:[%s4270_s1 + $0x640] sm:$0xff] }
  0x9d   : > { %1016 = vmatmul.mubr.f32.gmra.mrb[36].mxu0 %v279_v30  ;;  %2682 = vmatprep.subr.bf16.mxu1 %v2681_v26  ;;  %v2725_v26 = vpack.c.bf16 %v626_v17, %v625_v16  ;;  %v193_v30 = vld [vmem:[%s3013_s25 + $0xd0] sm:$0xff]  ;;  %v584_v8 = vld [vmem:[%s4270_s1 + $0x648] sm:$0xff]  ;;  %v602_v13 = vld [vmem:[%s4270_s1 + $0x6d8] sm:$0xff] }
  0x9e   : > { %1141 = vmatmul.mubr.f32.gmra.mrb[36].mxu1 %v281_v33  ;;  %1020 = vmatprep.mubr.f32.mxu0 %v298_v34  ;;  %v195_v33 = vld [vmem:[%s3013_s25 + $0xe0] sm:$0xff]  ;;  %v212_v34 = vld [vmem:[%s3013_s25 + $0x168] sm:$0xff]  ;;  %v601_v12 = vld [vmem:[%s4270_s1 + $0x6d0] sm:$0xff] }
  0x9f   : > { %1145 = vmatprep.mubr.f32.mxu1 %v300_v35  ;;  %2652 = vmatpush3.bf16.msra.mxu0 %v2651_v36  ;;  %v214_v35 = vld [vmem:[%s3013_s25 + $0x178] sm:$0xff]  ;;  %v2695_v36 = vpack.c.bf16 %v578_v24, %v577_v23  ;;  %v616_v11 = vld [vmem:[%s4270_s1 + $0x748] sm:$0xff]  ;;  %v249_v17 = vld [vmem:[%s3013_s25 + $0x290] sm:$0xff] }
  0xa0   : > { %2684 = vmatpush3.bf16.msra.mxu1 %v2683_v37  ;;  %2654 = vmatprep.subr.bf16.mxu0 %v2653_v38  ;;  %v2727_v37 = vpack.c.bf16 %v610_v27, %v609_v25  ;;  %v2697_v38 = vpack.c.bf16 %v596_v29, %v595_v28  ;;  %v634_v16 = vld [vmem:[%s4270_s1 + $0x7d8] sm:$0xff]  ;;  %v585_v23 = vld [vmem:[%s4270_s1 + $0x650] sm:$0xff]  ;;  %v603_v28 = vld [vmem:[%s4270_s1 + $0x6e0] sm:$0xff] }
  0xa1   : > { %1021 = vmatmul.mubr.f32.gmra.mrb[38].mxu0 %v297_v46  ;;  %2686 = vmatprep.subr.bf16.mxu1 %v2685_v42  ;;  %v2729_v42 = vpack.c.bf16 %v628_v32, %v627_v31  ;;  %v211_v46 = vld [vmem:[%s3013_s25 + $0x160] sm:$0xff]  ;;  %v586_v24 = vld [vmem:[%s4270_s1 + $0x658] sm:$0xff]  ;;  %v617_v25 = vld [vmem:[%s4270_s1 + $0x750] sm:$0xff] }
  0xa2   : > { %1146 = vmatmul.mubr.f32.gmra.mrb[38].mxu1 %v299_v49  ;;  %1025 = vmatprep.mubr.f32.mxu0 %v316_v50  ;;  %v213_v49 = vld [vmem:[%s3013_s25 + $0x170] sm:$0xff]  ;;  %v230_v50 = vld [vmem:[%s3013_s25 + $0x1f8] sm:$0xff]  ;;  %v604_v29 = vld [vmem:[%s4270_s1 + $0x6e8] sm:$0xff] }
  0xa3   : > { %1150 = vmatprep.mubr.f32.mxu1 %v318_v52  ;;  %2656 = vmatpush3.bf16.msra.mxu0 %v2655_v51  ;;  %v232_v51 = vld [vmem:[%s3013_s25 + $0x208] sm:$0xff]  ;;  %v2699_v52 = vpack.c.bf16 %v580_v40, %v579_v39  ;;  %v618_v27 = vld [vmem:[%s4270_s1 + $0x758] sm:$0xff]  ;;  %v635_v31 = vld [vmem:[%s4270_s1 + $0x7e0] sm:$0xff] }
  0xa4   : > { %2688 = vmatpush3.bf16.msra.mxu1 %v2687_v53  ;;  %2690 = vmatprep.subr.bf16.mxu0 %v2689_v54  ;;  %v2731_v53 = vpack.c.bf16 %v612_v43, %v611_v41  ;;  %v2701_v54 = vpack.c.bf16 %v598_v45, %v597_v44  ;;  %v636_v32 = vld [vmem:[%s4270_s1 + $0x7e8] sm:$0xff]  ;;  %v587_v39 = vld [vmem:[%s4270_s1 + $0x660] sm:$0xff]  ;;  %v605_v44 = vld [vmem:[%s4270_s1 + $0x6f0] sm:$0xff] }
  0xa5   : > { %1026 = vmatmul.mubr.f32.gmra.mrb[40].mxu0 %v315_v56  ;;  %2722 = vmatprep.subr.bf16.mxu1 %v2721_v55  ;;  %v581_v55 = vld [vmem:[%s4270_s1 + $0x630] sm:$0xff]  ;;  %v582_v56 = vld [vmem:[%s4270_s1 + $0x638] sm:$0xff]  ;;  %v588_v40 = vld [vmem:[%s4270_s1 + $0x668] sm:$0xff] }
  0xa6   : > { %1151 = vmatmul.mubr.f32.gmra.mrb[40].mxu1 %v317_v57  ;;  %1030 = vmatprep.mubr.f32.mxu0 %v334_v58  ;;  %v613_v57 = vld [vmem:[%s4270_s1 + $0x730] sm:$0xff]  ;;  %v2733_v58 = vpack.c.bf16 %v630_v48, %v629_v47  ;;  %v619_v41 = vld [vmem:[%s4270_s1 + $0x760] sm:$0xff]  ;;  %v620_v43 = vld [vmem:[%s4270_s1 + $0x768] sm:$0xff] }
  0xa7   : > { %1155 = vmatprep.mubr.f32.mxu1 %v336_v59  ;;  %v614_v59 = vld [vmem:[%s4270_s1 + $0x738] sm:$0xff]  ;;  %v637_v47 = vld [vmem:[%s4270_s1 + $0x7f0] sm:$0xff] }
  0xa8   : > { %v606_v45 = vld [vmem:[%s4270_s1 + $0x6f8] sm:$0xff] }
  0xa9   : > { %1031 = vmatmul.mubr.f32.gmra.mrb[42].mxu0 %v333_v60  ;;  %v599_v60 = vld [vmem:[%s4270_s1 + $0x6c0] sm:$0xff]  ;;  %v638_v48 = vld [vmem:[%s4270_s1 + $0x7f8] sm:$0xff] }
  0xaa   : > { %1156 = vmatmul.mubr.f32.gmra.mrb[42].mxu1 %v335_v61  ;;  %1035 = vmatprep.mubr.f32.mxu0 %v352_v62  ;;  %v600_v61 = vld [vmem:[%s4270_s1 + $0x6c8] sm:$0xff]  ;;  %v229_v62 = vld [vmem:[%s3013_s25 + $0x1f0] sm:$0xff] }
  0xab   : > { %1160 = vmatprep.mubr.f32.mxu1 %v354_v63  ;;  %v631_v63 = vld [vmem:[%s4270_s1 + $0x7c0] sm:$0xff] }
  0xad   : > { %1036 = vmatmul.mubr.f32.gmra.mrb[44].mxu0 %v351_v0  ;;  %v632_v0 = vld [vmem:[%s4270_s1 + $0x7c8] sm:$0xff] }
  0xae   : > { %1161 = vmatmul.mubr.f32.gmra.mrb[44].mxu1 %v353_v1  ;;  %1040 = vmatprep.mubr.f32.mxu0 %v370_v2  ;;  %v231_v1 = vld [vmem:[%s3013_s25 + $0x200] sm:$0xff]  ;;  %v248_v2 = vld [vmem:[%s3013_s25 + $0x288] sm:$0xff]  ;;  %v2737_v10 = vpack.c.bf16 %v632_v0, %v631_v63 }
  0xaf   : > { %1165 = vmatprep.mubr.f32.mxu1 %v372_v3  ;;  %v250_v3 = vld [vmem:[%s3013_s25 + $0x298] sm:$0xff]  ;;  %v303_v63 = vld [vmem:[%s3013_s25 + $0x440] sm:$0xff]  ;;  %v320_v0 = vld [vmem:[%s3013_s25 + $0x4c8] sm:$0xff] }
  0xb1   : > { %1041 = vmatmul.mubr.f32.gmra.mrb[46].mxu0 %v369_v4  ;;  %v2703_v4 = vpack.c.bf16 %v582_v56, %v581_v55  ;;  %v589_v55 = vld [vmem:[%s4270_s1 + $0x670] sm:$0xff]  ;;  %v590_v56 = vld [vmem:[%s4270_s1 + $0x678] sm:$0xff] }
  0xb2   : > { %1166 = vmatmul.mubr.f32.gmra.mrb[46].mxu1 %v371_v5  ;;  %1235 = vmatprep.mubr.f32.mxu0 %v176_v6  ;;  %v2735_v5 = vpack.c.bf16 %v614_v59, %v613_v57  ;;  %v2705_v6 = vpack.c.bf16 %v600_v61, %v599_v60  ;;  %v621_v57 = vld [vmem:[%s4270_s1 + $0x770] sm:$0xff]  ;;  %v622_v59 = vld [vmem:[%s4270_s1 + $0x778] sm:$0xff]  ;;  %v655_v60 = vld [vmem:[%s4270_s1 + $0x880] sm:$0xff] }
  0xb3   : > { %1360 = vmatprep.mubr.f32.mxu1 %v178_v9  ;;  %v615_v9 = vld [vmem:[%s4270_s1 + $0x740] sm:$0xff]  ;;  %v656_v61 = vld [vmem:[%s4270_s1 + $0x888] sm:$0xff] }
  0xb5   : > { %1236 = vmatmul.mubr.f32.vlgmr.msra.gmra.mrb[48].mxu0 %v175_v14  ;;  %v247_v14 = vld [vmem:[%s3013_s25 + $0x280] sm:$0xff] }
  0xb6   : > { %1361 = vmatmul.mubr.f32.vlgmr.msra.gmra.mrb[48].mxu1 %v177_v18  ;;  %2692 = vmatpush3.bf16.msra.mxu0 %v2691_v15  ;;  %v633_v15 = vld [vmem:[%s4270_s1 + $0x7d0] sm:$0xff]  ;;  %v266_v18 = vld [vmem:[%s3013_s25 + $0x318] sm:$0xff] }
  0xb7   : > { %2724 = vmatpush3.bf16.msra.mxu1 %v2723_v19  ;;  %1240 = vmatprep.mubr.f32.mxu0 %v194_v20  ;;  %v268_v19 = vld [vmem:[%s3013_s25 + $0x328] sm:$0xff]  ;;  %v2707_v20 = vpack.c.bf16 %v584_v8, %v583_v7  ;;  %v338_v7 = vld [vmem:[%s3013_s25 + $0x558] sm:$0xff] }
  0xb8   : > { %1365 = vmatprep.mubr.f32.mxu1 %v196_v21  ;;  %2694 = vmatprep.subr.bf16.mxu0 %v2693_v22  ;;  %v2739_v21 = vpack.c.bf16 %v616_v11, %v615_v9  ;;  %v2709_v22 = vpack.c.bf16 %v602_v13, %v601_v12  ;;  %v340_v8 = vld [vmem:[%s3013_s25 + $0x568] sm:$0xff]  ;;  %v337_v9 = vld [vmem:[%s3013_s25 + $0x550] sm:$0xff]  ;;  %v358_v12 = vld [vmem:[%s3013_s25 + $0x5f8] sm:$0xff] }
  0xb9   : > { %1241 = vmatmul.mubr.f32.gmra.mrb[50].mxu0 %v193_v30  ;;  %2726 = vmatprep.subr.bf16.mxu1 %v2725_v26  ;;  %v2741_v26 = vpack.c.bf16 %v634_v16, %v633_v15  ;;  %v265_v30 = vld [vmem:[%s3013_s25 + $0x310] sm:$0xff]  ;;  %v356_v11 = vld [vmem:[%s3013_s25 + $0x5e8] sm:$0xff]  ;;  %v355_v13 = vld [vmem:[%s3013_s25 + $0x5e0] sm:$0xff] }
  0xba   : > { %1366 = vmatmul.mubr.f32.gmra.mrb[50].mxu1 %v195_v33  ;;  %1245 = vmatprep.mubr.f32.mxu0 %v212_v34  ;;  %v267_v33 = vld [vmem:[%s3013_s25 + $0x320] sm:$0xff]  ;;  %v284_v34 = vld [vmem:[%s3013_s25 + $0x3a8] sm:$0xff]  ;;  %v374_v15 = vld [vmem:[%s3013_s25 + $0x678] sm:$0xff] }
  0xbb   : > { %1370 = vmatprep.mubr.f32.mxu1 %v214_v35  ;;  %2696 = vmatpush3.bf16.msra.mxu0 %v2695_v36  ;;  %v286_v35 = vld [vmem:[%s3013_s25 + $0x3b8] sm:$0xff]  ;;  %v2711_v36 = vpack.c.bf16 %v586_v24, %v585_v23  ;;  %v376_v16 = vld [vmem:[%s3013_s25 + $0x688] sm:$0xff]  ;;  %v657_v23 = vld [vmem:[%s4270_s1 + $0x890] sm:$0xff] }
  0xbc   : > { %2728 = vmatpush3.bf16.msra.mxu1 %v2727_v37  ;;  %2698 = vmatprep.subr.bf16.mxu0 %v2697_v38  ;;  %v2743_v37 = vpack.c.bf16 %v618_v27, %v617_v25  ;;  %v2713_v38 = vpack.c.bf16 %v604_v29, %v603_v28  ;;  %v658_v24 = vld [vmem:[%s4270_s1 + $0x898] sm:$0xff]  ;;  %v179_v25 = vld [vmem:[%s3013_s25 + $0x60] sm:$0xff]  ;;  %v181_v27 = vld [vmem:[%s3013_s25 + $0x70] sm:$0xff] }
  0xbd   : > { %1246 = vmatmul.mubr.f32.gmra.mrb[52].mxu0 %v211_v46  ;;  %2730 = vmatprep.subr.bf16.mxu1 %v2729_v42  ;;  %v2745_v42 = vpack.c.bf16 %v636_v32, %v635_v31  ;;  %v283_v46 = vld [vmem:[%s3013_s25 + $0x3a0] sm:$0xff]  ;;  %v198_v28 = vld [vmem:[%s3013_s25 + $0xf8] sm:$0xff]  ;;  %v2757_v29 = vpack.c.bf16 %v658_v24, %v657_v23  ;;  %v200_v32 = vld [vmem:[%s3013_s25 + $0x108] sm:$0xff] }
  0xbe   : > { %1371 = vmatmul.mubr.f32.gmra.mrb[52].mxu1 %v213_v49  ;;  %1250 = vmatprep.mubr.f32.mxu0 %v230_v50  ;;  %v285_v49 = vld [vmem:[%s3013_s25 + $0x3b0] sm:$0xff]  ;;  %v302_v50 = vld [vmem:[%s3013_s25 + $0x438] sm:$0xff] }
  0xbf   : > { %1375 = vmatprep.mubr.f32.mxu1 %v232_v51  ;;  %2700 = vmatpush3.bf16.msra.mxu0 %v2699_v52  ;;  %v304_v51 = vld [vmem:[%s3013_s25 + $0x448] sm:$0xff]  ;;  %v2715_v52 = vpack.c.bf16 %v588_v40, %v587_v39  ;;  %v642_v31 = vld [vmem:[%s4270_s1 + $0x818] sm:$0xff] }
  0xc0   : > { %2732 = vmatpush3.bf16.msra.mxu1 %v2731_v53  ;;  %2702 = vmatprep.subr.bf16.mxu0 %v2701_v54  ;;  %v2747_v53 = vpack.c.bf16 %v620_v43, %v619_v41  ;;  %v2717_v54 = vpack.c.bf16 %v606_v45, %v605_v44  ;;  %v218_v39 = vld [vmem:[%s3013_s25 + $0x198] sm:$0xff]  ;;  %v643_v41 = vld [vmem:[%s4270_s1 + $0x820] sm:$0xff]  ;;  %v661_v43 = vld [vmem:[%s4270_s1 + $0x8b0] sm:$0xff] }
  0xc1   : > { %1251 = vmatmul.mubr.f32.gmra.mrb[54].mxu0 %v229_v62  ;;  %2734 = vmatprep.subr.bf16.mxu1 %v2733_v58  ;;  %v2749_v58 = vpack.c.bf16 %v638_v48, %v637_v47  ;;  %v301_v62 = vld [vmem:[%s3013_s25 + $0x430] sm:$0xff]  ;;  %v662_v44 = vld [vmem:[%s4270_s1 + $0x8b8] sm:$0xff]  ;;  %v215_v45 = vld [vmem:[%s3013_s25 + $0x180] sm:$0xff] }
  0xc2   : > { %1376 = vmatmul.mubr.f32.gmra.mrb[54].mxu1 %v231_v1  ;;  %1255 = vmatprep.mubr.f32.mxu0 %v248_v2  ;;  %v2719_v1 = vpack.c.bf16 %v590_v56, %v589_v55  ;;  %v322_v2 = vld [vmem:[%s3013_s25 + $0x4d8] sm:$0xff]  ;;  %v233_v55 = vld [vmem:[%s3013_s25 + $0x210] sm:$0xff]  ;;  %v235_v56 = vld [vmem:[%s3013_s25 + $0x220] sm:$0xff] }
  0xc3   : > { %1380 = vmatprep.mubr.f32.mxu1 %v250_v3  ;;  %2704 = vmatpush3.bf16.msra.mxu0 %v2703_v4  ;;  %v2751_v3 = vpack.c.bf16 %v622_v59, %v621_v57  ;;  %v2753_v4 = vpack.c.bf16 %v656_v61, %v655_v60  ;;  %v234_v47 = vld [vmem:[%s3013_s25 + $0x218] sm:$0xff]  ;;  %v252_v57 = vld [vmem:[%s3013_s25 + $0x2a8] sm:$0xff]  ;;  %v647_v61 = vld [vmem:[%s4270_s1 + $0x840] sm:$0xff] }
  0xc4   : > { %2736 = vmatpush3.bf16.msra.mxu1 %v2735_v5  ;;  %2706 = vmatprep.subr.bf16.mxu0 %v2705_v6  ;;  %v319_v5 = vld [vmem:[%s3013_s25 + $0x4c0] sm:$0xff]  ;;  %v321_v6 = vld [vmem:[%s3013_s25 + $0x4d0] sm:$0xff]  ;;  %v254_v59 = vld [vmem:[%s3013_s25 + $0x2b8] sm:$0xff] }
  0xc5   : > { %1256 = vmatmul.mubr.f32.gmra.mrb[56].mxu0 %v247_v14  ;;  %2738 = vmatprep.subr.bf16.mxu1 %v2737_v10  ;;  %v339_v10 = vld [vmem:[%s3013_s25 + $0x560] sm:$0xff]  ;;  %v357_v14 = vld [vmem:[%s3013_s25 + $0x5f0] sm:$0xff]  ;;  %v306_v23 = vld [vmem:[%s3013_s25 + $0x458] sm:$0xff] }
  0xc6   : > { %1381 = vmatmul.mubr.f32.gmra.mrb[56].mxu1 %v249_v17  ;;  %1260 = vmatprep.mubr.f32.mxu0 %v266_v18  ;;  %v373_v17 = vld [vmem:[%s3013_s25 + $0x670] sm:$0xff]  ;;  %v375_v18 = vld [vmem:[%s3013_s25 + $0x680] sm:$0xff] }
  0xc7   : > { %1385 = vmatprep.mubr.f32.mxu1 %v268_v19  ;;  %2708 = vmatpush3.bf16.msra.mxu0 %v2707_v20  ;;  %v180_v19 = vld [vmem:[%s3013_s25 + $0x68] sm:$0xff]  ;;  %v639_v20 = vld [vmem:[%s4270_s1 + $0x800] sm:$0xff] }
  0xc8   : > { %2740 = vmatpush3.bf16.msra.mxu1 %v2739_v21  ;;  %2710 = vmatprep.subr.bf16.mxu0 %v2709_v22  ;;  %v640_v21 = vld [vmem:[%s4270_s1 + $0x808] sm:$0xff]  ;;  %v182_v22 = vld [vmem:[%s3013_s25 + $0x78] sm:$0xff] }
  0xc9   : > { %1261 = vmatmul.mubr.f32.gmra.mrb[58].mxu0 %v265_v30  ;;  %2742 = vmatprep.subr.bf16.mxu1 %v2741_v26  ;;  %v2755_v26 = vpack.c.bf16 %v640_v21, %v639_v20  ;;  %v641_v30 = vld [vmem:[%s4270_s1 + $0x810] sm:$0xff]  ;;  %v670_v20 = vld [vmem:[%s4270_s1 + $0x8f8] sm:$0xff]  ;;  %v287_v21 = vld [vmem:[%s3013_s25 + $0x3c0] sm:$0xff] }
  0xca   : > { %1386 = vmatmul.mubr.f32.gmra.mrb[58].mxu1 %v267_v33  ;;  %1265 = vmatprep.mubr.f32.mxu0 %v284_v34  ;;  %v659_v33 = vld [vmem:[%s4270_s1 + $0x8a0] sm:$0xff]  ;;  %v660_v34 = vld [vmem:[%s4270_s1 + $0x8a8] sm:$0xff] }
  0xcb   : > { %1390 = vmatprep.mubr.f32.mxu1 %v286_v35  ;;  %2712 = vmatpush3.bf16.msra.mxu0 %v2711_v36  ;;  %v197_v35 = vld [vmem:[%s3013_s25 + $0xf0] sm:$0xff]  ;;  %v199_v36 = vld [vmem:[%s3013_s25 + $0x100] sm:$0xff]  ;;  %v2761_v40 = vpack.c.bf16 %v660_v34, %v659_v33  ;;  %v326_v33 = vld [vmem:[%s3013_s25 + $0x4f8] sm:$0xff] }
  0xcc   : > { %2744 = vmatpush3.bf16.msra.mxu1 %v2743_v37  ;;  %2714 = vmatprep.subr.bf16.mxu0 %v2713_v38  ;;  %v216_v37 = vld [vmem:[%s3013_s25 + $0x188] sm:$0xff]  ;;  %v2759_v38 = vpack.c.bf16 %v642_v31, %v641_v30  ;;  %v307_v30 = vld [vmem:[%s3013_s25 + $0x460] sm:$0xff] }
  0xcd   : > { %1266 = vmatmul.mubr.f32.gmra.mrb[60].mxu0 %v283_v46  ;;  %2746 = vmatprep.subr.bf16.mxu1 %v2745_v42  ;;  %v644_v42 = vld [vmem:[%s4270_s1 + $0x828] sm:$0xff]  ;;  %v217_v46 = vld [vmem:[%s3013_s25 + $0x190] sm:$0xff]  ;;  %v323_v34 = vld [vmem:[%s3013_s25 + $0x4e0] sm:$0xff] }
  0xce   : > { %1391 = vmatmul.mubr.f32.gmra.mrb[60].mxu1 %v285_v49  ;;  %1270 = vmatprep.mubr.f32.mxu0 %v302_v50  ;;  %v2763_v48 = vpack.c.bf16 %v644_v42, %v643_v41  ;;  %v236_v49 = vld [vmem:[%s3013_s25 + $0x228] sm:$0xff]  ;;  %v2765_v50 = vpack.c.bf16 %v662_v44, %v661_v43  ;;  %v362_v41 = vld [vmem:[%s3013_s25 + $0x618] sm:$0xff]  ;;  %v359_v42 = vld [vmem:[%s3013_s25 + $0x600] sm:$0xff] }
  0xcf   : > { %1395 = vmatprep.mubr.f32.mxu1 %v304_v51  ;;  %2716 = vmatpush3.bf16.msra.mxu0 %v2715_v52  ;;  %v645_v51 = vld [vmem:[%s4270_s1 + $0x830] sm:$0xff]  ;;  %v646_v52 = vld [vmem:[%s4270_s1 + $0x838] sm:$0xff]  ;;  %v324_v31 = vld [vmem:[%s3013_s25 + $0x4e8] sm:$0xff] }
  0xd0   : > { %2748 = vmatpush3.bf16.msra.mxu1 %v2747_v53  ;;  %2718 = vmatprep.subr.bf16.mxu0 %v2717_v54  ;;  %v663_v53 = vld [vmem:[%s4270_s1 + $0x8c0] sm:$0xff]  ;;  %v664_v54 = vld [vmem:[%s4270_s1 + $0x8c8] sm:$0xff]  ;;  %v361_v43 = vld [vmem:[%s3013_s25 + $0x610] sm:$0xff] }
  0xd1   : > { %1271 = vmatmul.mubr.f32.gmra.mrb[62].mxu0 %v301_v62  ;;  %2750 = vmatprep.subr.bf16.mxu1 %v2749_v58  ;;  %v2767_v58 = vpack.c.bf16 %v646_v52, %v645_v51  ;;  %v2769_v60 = vpack.c.bf16 %v664_v54, %v663_v53  ;;  %v648_v62 = vld [vmem:[%s4270_s1 + $0x848] sm:$0xff]  ;;  %v378_v44 = vld [vmem:[%s3013_s25 + $0x698] sm:$0xff]  ;;  %v291_v51 = vld [vmem:[%s3013_s25 + $0x3e0] sm:$0xff] }
  0xd2   : > { %1396 = vmatmul.mubr.f32.gmra.mrb[62].mxu1 %v303_v63  ;;  %1275 = vmatprep.mubr.f32.mxu0 %v320_v0  ;;  %v665_v63 = vld [vmem:[%s4270_s1 + $0x8d0] sm:$0xff]  ;;  %v666_v0 = vld [vmem:[%s4270_s1 + $0x8d8] sm:$0xff] }
  0xd3   : > { %1400 = vmatprep.mubr.f32.mxu1 %v322_v2  ;;  %2720 = vmatpush3.bf16.msra.mxu0 %v2719_v1  ;;  %v251_v1 = vld [vmem:[%s3013_s25 + $0x2a0] sm:$0xff]  ;;  %v253_v2 = vld [vmem:[%s3013_s25 + $0x2b0] sm:$0xff]  ;;  %v202_v52 = vld [vmem:[%s3013_s25 + $0x118] sm:$0xff] }
  0xd4   : > { %2752 = vmatpush3.bf16.msra.mxu1 %v2751_v3  ;;  %2754 = vmatprep.subr.bf16.mxu0 %v2753_v4  ;;  %v270_v3 = vld [vmem:[%s3013_s25 + $0x338] sm:$0xff]  ;;  %v201_v54 = vld [vmem:[%s3013_s25 + $0x110] sm:$0xff] }
  0xd5   : > { %1276 = vmatmul.mubr.f32.gmra.mrb[64].mxu0 %v319_v5  ;;  %2785 = vmatprep.subr.bf16.mxu1 %v2753_v4  ;;  %v2771_v4 = vpack.c.bf16 %v648_v62, %v647_v61  ;;  %v272_v5 = vld [vmem:[%s3013_s25 + $0x348] sm:$0xff]  ;;  %v310_v53 = vld [vmem:[%s3013_s25 + $0x478] sm:$0xff]  ;;  %v237_v62 = vld [vmem:[%s3013_s25 + $0x230] sm:$0xff] }
  0xd6   : > { %1401 = vmatmul.mubr.f32.gmra.mrb[64].mxu1 %v321_v6  ;;  %1280 = vmatprep.mubr.f32.mxu0 %v338_v7  ;;  %v2773_v6 = vpack.c.bf16 %v666_v0, %v665_v63  ;;  %v649_v7 = vld [vmem:[%s4270_s1 + $0x850] sm:$0xff]  ;;  %v346_v61 = vld [vmem:[%s3013_s25 + $0x598] sm:$0xff]  ;;  %v256_v0 = vld [vmem:[%s3013_s25 + $0x2c8] sm:$0xff] }
  0xd7   : > { %1405 = vmatprep.mubr.f32.mxu1 %v340_v8  ;;  %v650_v8 = vld [vmem:[%s4270_s1 + $0x858] sm:$0xff]  ;;  %v345_v63 = vld [vmem:[%s3013_s25 + $0x590] sm:$0xff] }
  0xd9   : > { %1281 = vmatmul.mubr.f32.gmra.mrb[66].mxu0 %v337_v9  ;;  %v667_v9 = vld [vmem:[%s4270_s1 + $0x8e0] sm:$0xff] }
  0xda   : > { %1406 = vmatmul.mubr.f32.gmra.mrb[66].mxu1 %v339_v10  ;;  %1285 = vmatprep.mubr.f32.mxu0 %v356_v11  ;;  %v668_v10 = vld [vmem:[%s4270_s1 + $0x8e8] sm:$0xff]  ;;  %v269_v11 = vld [vmem:[%s3013_s25 + $0x330] sm:$0xff] }
  0xdb   : > { %1410 = vmatprep.mubr.f32.mxu1 %v358_v12  ;;  %v271_v12 = vld [vmem:[%s3013_s25 + $0x340] sm:$0xff] }
  0xdd   : > { %1286 = vmatmul.mubr.f32.gmra.mrb[68].mxu0 %v355_v13  ;;  %v288_v13 = vld [vmem:[%s3013_s25 + $0x3c8] sm:$0xff] }
  0xde   : > { %1411 = vmatmul.mubr.f32.gmra.mrb[68].mxu1 %v357_v14  ;;  %1290 = vmatprep.mubr.f32.mxu0 %v374_v15  ;;  %v2775_v14 = vpack.c.bf16 %v650_v8, %v649_v7  ;;  %v290_v15 = vld [vmem:[%s3013_s25 + $0x3d8] sm:$0xff]  ;;  %v381_v7 = vld [vmem:[%s3013_s25 + $0x6b0] sm:$0xff] }
  0xdf   : > { %1415 = vmatprep.mubr.f32.mxu1 %v376_v16  ;;  %v2777_v16 = vpack.c.bf16 %v668_v10, %v667_v9 }
  0xe1   : > { %1291 = vmatmul.mubr.f32.gmra.mrb[70].mxu0 %v373_v17  ;;  %v651_v17 = vld [vmem:[%s4270_s1 + $0x860] sm:$0xff] }
  0xe2   : > { %1416 = vmatmul.mubr.f32.gmra.mrb[70].mxu1 %v375_v18  ;;  %1485 = vmatprep.mubr.f32.mxu0 %v180_v19  ;;  %v652_v18 = vld [vmem:[%s4270_s1 + $0x868] sm:$0xff]  ;;  %v669_v19 = vld [vmem:[%s4270_s1 + $0x8f0] sm:$0xff] }
  0xe3   : > { %1610 = vmatprep.mubr.f32.mxu1 %v182_v22  ;;  %v289_v22 = vld [vmem:[%s3013_s25 + $0x3d0] sm:$0xff]  ;;  %v2779_v24 = vpack.c.bf16 %v652_v18, %v651_v17 }
  0xe5   : > { %1486 = vmatmul.mubr.f32.vlgmr.msra.gmra.mrb[72].mxu0 %v179_v25  ;;  %v308_v25 = vld [vmem:[%s3013_s25 + $0x468] sm:$0xff] }
  0xe6   : > { %1611 = vmatmul.mubr.f32.vlgmr.msra.gmra.mrb[72].mxu1 %v181_v27  ;;  %2756 = vmatpush3.bf16.msra.mxu0 %v2755_v26  ;;  %v653_v27 = vld [vmem:[%s4270_s1 + $0x870] sm:$0xff] }
  0xe7   : > { %2793 = vmatpush3.bf16.msra.mxu1 %v2755_v26  ;;  %1490 = vmatprep.mubr.f32.mxu0 %v198_v28  ;;  %v2781_v26 = vpack.c.bf16 %v670_v20, %v669_v19  ;;  %v654_v28 = vld [vmem:[%s4270_s1 + $0x878] sm:$0xff] }
  0xe8   : > { %1615 = vmatprep.mubr.f32.mxu1 %v200_v32  ;;  %2758 = vmatprep.subr.bf16.mxu0 %v2757_v29  ;;  %v2783_v32 = vpack.c.bf16 %v654_v28, %v653_v27 }
  0xe9   : > { %1491 = vmatmul.mubr.f32.gmra.mrb[74].mxu0 %v197_v35  ;;  %2786 = vmatprep.subr.bf16.mxu1 %v2757_v29  ;;  %v305_v29 = vld [vmem:[%s3013_s25 + $0x450] sm:$0xff] }
  0xea   : > { %1616 = vmatmul.mubr.f32.gmra.mrb[74].mxu1 %v199_v36  ;;  %1495 = vmatprep.mubr.f32.mxu0 %v216_v37  ;;  %v325_v35 = vld [vmem:[%s3013_s25 + $0x4f0] sm:$0xff]  ;;  %v342_v36 = vld [vmem:[%s3013_s25 + $0x578] sm:$0xff]  ;;  %v344_v37 = vld [vmem:[%s3013_s25 + $0x588] sm:$0xff] }
  0xeb   : > { %1620 = vmatprep.mubr.f32.mxu1 %v218_v39  ;;  %2760 = vmatpush3.bf16.msra.mxu0 %v2759_v38  ;;  %v343_v39 = vld [vmem:[%s3013_s25 + $0x580] sm:$0xff] }
  0xec   : > { %2794 = vmatpush3.bf16.msra.mxu1 %v2759_v38  ;;  %2762 = vmatprep.subr.bf16.mxu0 %v2761_v40  ;;  %v341_v38 = vld [vmem:[%s3013_s25 + $0x570] sm:$0xff] }
  0xed   : > { %1496 = vmatmul.mubr.f32.gmra.mrb[76].mxu0 %v215_v45  ;;  %2787 = vmatprep.subr.bf16.mxu1 %v2761_v40  ;;  %v360_v40 = vld [vmem:[%s3013_s25 + $0x608] sm:$0xff] }
  0xee   : > { %1621 = vmatmul.mubr.f32.gmra.mrb[76].mxu1 %v217_v46  ;;  %1500 = vmatprep.mubr.f32.mxu0 %v234_v47  ;;  %v380_v45 = vld [vmem:[%s3013_s25 + $0x6a8] sm:$0xff]  ;;  %v377_v46 = vld [vmem:[%s3013_s25 + $0x690] sm:$0xff]  ;;  %v379_v47 = vld [vmem:[%s3013_s25 + $0x6a0] sm:$0xff] }
  0xef   : > { %1625 = vmatprep.mubr.f32.mxu1 %v236_v49  ;;  %2764 = vmatpush3.bf16.msra.mxu0 %v2763_v48  ;;  %v292_v49 = vld [vmem:[%s3013_s25 + $0x3e8] sm:$0xff] }
  0xf0   : > { %2795 = vmatpush3.bf16.msra.mxu1 %v2763_v48  ;;  %2766 = vmatprep.subr.bf16.mxu0 %v2765_v50  ;;  %v184_v48 = vld [vmem:[%s3013_s25 + $0x88] sm:$0xff] }
  0xf1   : > { %1501 = vmatmul.mubr.f32.gmra.mrb[78].mxu0 %v233_v55  ;;  %2788 = vmatprep.subr.bf16.mxu1 %v2765_v50  ;;  %v183_v50 = vld [vmem:[%s3013_s25 + $0x80] sm:$0xff]  ;;  %v309_v55 = vld [vmem:[%s3013_s25 + $0x470] sm:$0xff] }
  0xf2   : > { %1626 = vmatmul.mubr.f32.gmra.mrb[78].mxu1 %v235_v56  ;;  %1505 = vmatprep.mubr.f32.mxu0 %v252_v57  ;;  %v220_v56 = vld [vmem:[%s3013_s25 + $0x1a8] sm:$0xff] }
  0xf3   : > { %1630 = vmatprep.mubr.f32.mxu1 %v254_v59  ;;  %2768 = vmatpush3.bf16.msra.mxu0 %v2767_v58  ;;  %v328_v57 = vld [vmem:[%s3013_s25 + $0x508] sm:$0xff]  ;;  %v327_v59 = vld [vmem:[%s3013_s25 + $0x500] sm:$0xff] }
  0xf4   : > { %2796 = vmatpush3.bf16.msra.mxu1 %v2767_v58  ;;  %2770 = vmatprep.subr.bf16.mxu0 %v2769_v60  ;;  %v219_v58 = vld [vmem:[%s3013_s25 + $0x1a0] sm:$0xff] }
  0xf5   : > { %1506 = vmatmul.mubr.f32.gmra.mrb[80].mxu0 %v251_v1  ;;  %2789 = vmatprep.subr.bf16.mxu1 %v2769_v60  ;;  %v238_v60 = vld [vmem:[%s3013_s25 + $0x238] sm:$0xff]  ;;  %v364_v1 = vld [vmem:[%s3013_s25 + $0x628] sm:$0xff] }
  0xf6   : > { %1631 = vmatmul.mubr.f32.gmra.mrb[80].mxu1 %v253_v2  ;;  %1510 = vmatprep.mubr.f32.mxu0 %v270_v3  ;;  %v255_v2 = vld [vmem:[%s3013_s25 + $0x2c0] sm:$0xff] }
  0xf7   : > { %1635 = vmatprep.mubr.f32.mxu1 %v272_v5  ;;  %2772 = vmatpush3.bf16.msra.mxu0 %v2771_v4  ;;  %v363_v3 = vld [vmem:[%s3013_s25 + $0x620] sm:$0xff]  ;;  %v382_v5 = vld [vmem:[%s3013_s25 + $0x6b8] sm:$0xff] }
  0xf8   : > { %2797 = vmatpush3.bf16.msra.mxu1 %v2771_v4  ;;  %2774 = vmatprep.subr.bf16.mxu0 %v2773_v6  ;;  %v274_v4 = vld [vmem:[%s3013_s25 + $0x358] sm:$0xff] }
  0xf9   : > { %1511 = vmatmul.mubr.f32.gmra.mrb[82].mxu0 %v269_v11  ;;  %2790 = vmatprep.subr.bf16.mxu1 %v2773_v6  ;;  %v273_v6 = vld [vmem:[%s3013_s25 + $0x350] sm:$0xff]  ;;  %s161_s25 = smul.u32 12, %s1876_s13 }
  0xfa   : > { %1636 = vmatmul.mubr.f32.gmra.mrb[82].mxu1 %v271_v12  ;;  %1515 = vmatprep.mubr.f32.mxu0 %v288_v13 }
  0xfb   : > { %1640 = vmatprep.mubr.f32.mxu1 %v290_v15  ;;  %2776 = vmatpush3.bf16.msra.mxu0 %v2775_v14  ;;  %p162_p7 = scmp.lt.s32.totalorder %s161_s25, 47 }
  0xfc   : > { %2798 = vmatpush3.bf16.msra.mxu1 %v2775_v14  ;;  %2778 = vmatprep.subr.bf16.mxu0 %v2777_v16 }
  0xfd   : > { %1516 = vmatmul.mubr.f32.gmra.mrb[84].mxu0 %v287_v21  ;;  %2791 = vmatprep.subr.bf16.mxu1 %v2777_v16  ;;  %s4279_s25 = smov (!%p162_p7, %s161_s25), 47 }
  0xfe   : > { %1641 = vmatmul.mubr.f32.gmra.mrb[84].mxu1 %v289_v22  ;;  %1520 = vmatprep.mubr.f32.mxu0 %v306_v23  ;;  %s1882_s12 = sshll.u32 %s4279_s25, 3 }
  0xff   : > { %1645 = vmatprep.mubr.f32.mxu1 %v308_v25  ;;  %2780 = vmatpush3.bf16.msra.mxu0 %v2779_v24  ;;  %s4224_s5 = scalar_lea.vmem %s4271_s2, %s1882_s12 }
 0x100   : > { %2799 = vmatpush3.bf16.msra.mxu1 %v2779_v24  ;;  %2782 = vmatprep.subr.bf16.mxu0 %v2781_v26 }
 0x101   : > { %1521 = vmatmul.mubr.f32.gmra.mrb[86].mxu0 %v305_v29  ;;  %2792 = vmatprep.subr.bf16.mxu1 %v2781_v26 }
 0x102   : > { %1646 = vmatmul.mubr.f32.gmra.mrb[86].mxu1 %v307_v30  ;;  %1525 = vmatprep.mubr.f32.mxu0 %v324_v31 }
 0x103   : > { %1650 = vmatprep.mubr.f32.mxu1 %v326_v33  ;;  %2784 = vmatpush3.bf16.msra.mxu0 %v2783_v32 }
 0x104   : > { %2800 = vmatpush3.bf16.msra.mxu1 %v2783_v32 }
 0x105   : > { %1526 = vmatmul.mubr.f32.gmra.mrb[88].mxu0 %v323_v34 }
 0x106   : > { %1651 = vmatmul.mubr.f32.gmra.mrb[88].mxu1 %v325_v35  ;;  %1530 = vmatprep.mubr.f32.mxu0 %v342_v36 }
 0x107   : > { %1655 = vmatprep.mubr.f32.mxu1 %v344_v37 }
 0x109   : > { %1531 = vmatmul.mubr.f32.gmra.mrb[90].mxu0 %v341_v38 }
 0x10a   : > { %1656 = vmatmul.mubr.f32.gmra.mrb[90].mxu1 %v343_v39  ;;  %1535 = vmatprep.mubr.f32.mxu0 %v360_v40 }
 0x10b   : > { %1660 = vmatprep.mubr.f32.mxu1 %v362_v41 }
 0x10d   : > { %1536 = vmatmul.mubr.f32.gmra.mrb[92].mxu0 %v359_v42 }
 0x10e   : > { %1661 = vmatmul.mubr.f32.gmra.mrb[92].mxu1 %v361_v43  ;;  %1540 = vmatprep.mubr.f32.mxu0 %v378_v44 }
 0x10f   : > { %1665 = vmatprep.mubr.f32.mxu1 %v380_v45 }
 0x111   : > { %1541 = vmatmul.mubr.f32.gmra.mrb[94].mxu0 %v377_v46 }
 0x112   : > { %1666 = vmatmul.mubr.f32.gmra.mrb[94].mxu1 %v379_v47  ;;  %1735 = vmatprep.mubr.f32.mxu0 %v184_v48 }
 0x113   : > { %1765 = vmatprep.mubr.f32.mxu1 %v292_v49 }
 0x115   : > { %1736 = vmatmul.mubr.f32.vlgmr.msra.gmra.mrb[96].mxu0 %v183_v50 }
 0x116   : > { %1766 = vmatmul.mubr.f32.vlgmr.msra.gmra.mrb[96].mxu1 %v291_v51  ;;  %1740 = vmatprep.mubr.f32.mxu0 %v202_v52 }
 0x117   : > { %1770 = vmatprep.mubr.f32.mxu1 %v310_v53 }
 0x119   : > { %1741 = vmatmul.mubr.f32.gmra.mrb[98].mxu0 %v201_v54 }
 0x11a   : > { %1771 = vmatmul.mubr.f32.gmra.mrb[98].mxu1 %v309_v55  ;;  %1745 = vmatprep.mubr.f32.mxu0 %v220_v56 }
 0x11b   : > { %1775 = vmatprep.mubr.f32.mxu1 %v328_v57 }
 0x11d   : > { %1746 = vmatmul.mubr.f32.gmra.mrb[100].mxu0 %v219_v58 }
 0x11e   : > { %1776 = vmatmul.mubr.f32.gmra.mrb[100].mxu1 %v327_v59  ;;  %1750 = vmatprep.mubr.f32.mxu0 %v238_v60 }
 0x11f   : > { %1780 = vmatprep.mubr.f32.mxu1 %v346_v61 }
 0x121   : > { %1751 = vmatmul.mubr.f32.gmra.mrb[102].mxu0 %v237_v62 }
 0x122   : > { %1781 = vmatmul.mubr.f32.gmra.mrb[102].mxu1 %v345_v63  ;;  %1755 = vmatprep.mubr.f32.mxu0 %v256_v0 }
 0x123   : > { %1785 = vmatprep.mubr.f32.mxu1 %v364_v1 }
 0x125   : > { %1756 = vmatmul.mubr.f32.gmra.mrb[104].mxu0 %v255_v2 }
 0x126   : > { %1786 = vmatmul.mubr.f32.gmra.mrb[104].mxu1 %v363_v3  ;;  %1760 = vmatprep.mubr.f32.mxu0 %v274_v4 }
 0x127   : > { %1790 = vmatprep.mubr.f32.mxu1 %v382_v5 }
 0x128   : > { %v1917_v8 = vpop.f32.mrb[0].mxu0 }
 0x129   : > { %v1985_v9 = vpop.f32.mrb[0].mxu1  ;;  %v1918_v10 = vpop.f32.mrb[1].mxu0  ;;  %1761 = vmatmul.mubr.f32.gmra.mrb[106].mxu0 %v273_v6 }
 0x12a   : > { %v1919_v11 = vadd.f32 %v1918_v10, %v1917_v8  ;;  %v1986_v12 = vpop.f32.mrb[1].mxu1  ;;  %1791 = vmatmul.mubr.f32.gmra.mrb[106].mxu1 %v381_v7 }
 0x12b   : > { %v1987_v13 = vadd.f32 %v1986_v12, %v1985_v9 }
 0x12c   : > { %v1920_v14 = vpop.f32.mrb[2].mxu0 }
 0x12d   : > { %v4099_v15 = vadd.f32 %v1987_v13, %v1919_v11  ;;  %v1988_v16 = vpop.f32.mrb[2].mxu1  ;;  %v1921_v17 = vpop.f32.mrb[3].mxu0 }
 0x12e   : > { %v1922_v18 = vadd.f32 %v1921_v17, %v1920_v14  ;;  %v1989_v19 = vpop.f32.mrb[3].mxu1 }
 0x12f   : > { %v1990_v20 = vadd.f32 %v1989_v19, %v1988_v16 }
 0x130   : > { %v1923_v21 = vpop.f32.mrb[4].mxu0 }
 0x131   : > { %v4101_v22 = vadd.f32 %v1990_v20, %v1922_v18  ;;  %v1991_v23 = vpop.f32.mrb[4].mxu1  ;;  %v1924_v24 = vpop.f32.mrb[5].mxu0 }
 0x132   : > { %v1925_v25 = vadd.f32 %v1924_v24, %v1923_v21  ;;  %v1992_v26 = vpop.f32.mrb[5].mxu1 }
 0x133   : > { %v1993_v27 = vadd.f32 %v1992_v26, %v1991_v23 }
 0x134   : > { %v1926_v28 = vpop.f32.mrb[6].mxu0 }
 0x135   : > { %v4103_v29 = vadd.f32 %v1993_v27, %v1925_v25  ;;  %v1994_v30 = vpop.f32.mrb[6].mxu1  ;;  %v1927_v31 = vpop.f32.mrb[7].mxu0 }
 0x136   : > { %v1928_v32 = vadd.f32 %v1927_v31, %v1926_v28  ;;  %v1995_v33 = vpop.f32.mrb[7].mxu1 }
 0x137   : > { %v1996_v34 = vadd.f32 %v1995_v33, %v1994_v30 }
 0x138   : > { %v1929_v35 = vpop.f32.mrb[8].mxu0 }
 0x139   : > { %v4105_v36 = vadd.f32 %v1996_v34, %v1928_v32  ;;  %v1997_v37 = vpop.f32.mrb[8].mxu1  ;;  %v1930_v38 = vpop.f32.mrb[9].mxu0 }
 0x13a   : > { %v1931_v39 = vadd.f32 %v1930_v38, %v1929_v35  ;;  %v1998_v40 = vpop.f32.mrb[9].mxu1 }
 0x13b   : > { %v1999_v41 = vadd.f32 %v1998_v40, %v1997_v37 }
 0x13c   : > { %v1932_v42 = vpop.f32.mrb[10].mxu0 }
 0x13d   : > { %v4107_v43 = vadd.f32 %v1999_v41, %v1931_v39  ;;  %v2000_v44 = vpop.f32.mrb[10].mxu1  ;;  %v1933_v45 = vpop.f32.mrb[11].mxu0 }
 0x13e   : > { %v1934_v46 = vadd.f32 %v1933_v45, %v1932_v42  ;;  %v2001_v47 = vpop.f32.mrb[11].mxu1 }
 0x13f   : > { %v2002_v48 = vadd.f32 %v2001_v47, %v2000_v44 }
 0x140   : > { %v1935_v49 = vpop.f32.mrb[12].mxu0 }
 0x141   : > { %v4109_v50 = vadd.f32 %v2002_v48, %v1934_v46  ;;  %v2003_v51 = vpop.f32.mrb[12].mxu1  ;;  %v1936_v52 = vpop.f32.mrb[13].mxu0 }
 0x142   : > { %v1937_v53 = vadd.f32 %v1936_v52, %v1935_v49  ;;  %v2004_v54 = vpop.f32.mrb[13].mxu1 }
 0x143   : > { %v2005_v55 = vadd.f32 %v2004_v54, %v2003_v51 }
 0x144   : > { %v1938_v56 = vpop.f32.mrb[14].mxu0 }
 0x145   : > { %v4111_v57 = vadd.f32 %v2005_v55, %v1937_v53  ;;  %v2006_v58 = vpop.f32.mrb[14].mxu1  ;;  %v1939_v59 = vpop.f32.mrb[15].mxu0 }
 0x146   : > { %v1940_v60 = vadd.f32 %v1939_v59, %v1938_v56  ;;  %v2007_v61 = vpop.f32.mrb[15].mxu1 }
 0x147   : > { %v2008_v62 = vadd.f32 %v2007_v61, %v2006_v58 }
 0x148   : > { %v1941_v63 = vpop.f32.mrb[16].mxu0 }
 0x149   : > { %v4113_v0 = vadd.f32 %v2008_v62, %v1940_v60  ;;  %v2009_v1 = vpop.f32.mrb[16].mxu1  ;;  %v1942_v2 = vpop.f32.mrb[17].mxu0 }
 0x14a   : > { %v1943_v3 = vadd.f32 %v1942_v2, %v1941_v63  ;;  %v2010_v4 = vpop.f32.mrb[17].mxu1 }
 0x14b   : > { %v2011_v5 = vadd.f32 %v2010_v4, %v2009_v1 }
 0x14c   : > { %v1944_v6 = vpop.f32.mrb[18].mxu0 }
 0x14d   : > { %v4115_v7 = vadd.f32 %v2011_v5, %v1943_v3  ;;  %v2012_v8 = vpop.f32.mrb[18].mxu1  ;;  %v1945_v9 = vpop.f32.mrb[19].mxu0 }
 0x14e   : > { %v1946_v10 = vadd.f32 %v1945_v9, %v1944_v6  ;;  %v2013_v11 = vpop.f32.mrb[19].mxu1 }
 0x14f   : > { %v2014_v12 = vadd.f32 %v2013_v11, %v2012_v8 }
 0x150   : > { %v1947_v13 = vpop.f32.mrb[20].mxu0 }
 0x151   : > { %v4117_v14 = vadd.f32 %v2014_v12, %v1946_v10  ;;  %v2015_v16 = vpop.f32.mrb[20].mxu1  ;;  %v1948_v17 = vpop.f32.mrb[21].mxu0 }
 0x152   : > { %v1949_v18 = vadd.f32 %v1948_v17, %v1947_v13  ;;  %v2016_v19 = vpop.f32.mrb[21].mxu1 }
 0x153   : > { %v2017_v20 = vadd.f32 %v2016_v19, %v2015_v16 }
 0x154   : > { %v1950_v21 = vpop.f32.mrb[22].mxu0 }
 0x155   : > { %v4119_v23 = vadd.f32 %v2017_v20, %v1949_v18  ;;  %v2018_v24 = vpop.f32.mrb[22].mxu1  ;;  %v1951_v25 = vpop.f32.mrb[23].mxu0 }
 0x156   : > { %v1952_v26 = vadd.f32 %v1951_v25, %v1950_v21  ;;  %v2019_v27 = vpop.f32.mrb[23].mxu1 }
 0x157   : > { %v2020_v28 = vadd.f32 %v2019_v27, %v2018_v24 }
 0x158   : > { %v2053_v30 = vpop.f32.mrb[24].mxu0 }
 0x159   : > { %v4121_v31 = vadd.f32 %v2020_v28, %v1952_v26  ;;  %v2121_v32 = vpop.f32.mrb[24].mxu1  ;;  %v2054_v33 = vpop.f32.mrb[25].mxu0 }
 0x15a   : > { %v2055_v34 = vadd.f32 %v2054_v33, %v2053_v30  ;;  %v2122_v35 = vpop.f32.mrb[25].mxu1 }
 0x15b   : > { %v2123_v37 = vadd.f32 %v2122_v35, %v2121_v32 }
 0x15c   : > { %v988_v38 = vadd.f32 %v2055_v34, %v4099_v15  ;;  %v2056_v39 = vpop.f32.mrb[26].mxu0 }
 0x15d   : > { %v2124_v40 = vpop.f32.mrb[26].mxu1  ;;  %v2057_v41 = vpop.f32.mrb[27].mxu0 }
 0x15e   : > { %v4124_v42 = vadd.f32 %v2123_v37, %v988_v38  ;;  %v2058_v44 = vadd.f32 %v2057_v41, %v2056_v39  ;;  %v2125_v45 = vpop.f32.mrb[27].mxu1 }
 0x15f   : > { %v2126_v46 = vadd.f32 %v2125_v45, %v2124_v40 }
 0x160   : > { %v993_v47 = vadd.f32 %v2058_v44, %v4101_v22  ;;  %v2059_v48 = vpop.f32.mrb[28].mxu0 }
 0x161   : > { %v2127_v49 = vpop.f32.mrb[28].mxu1  ;;  %v2060_v51 = vpop.f32.mrb[29].mxu0 }
 0x162   : > { %v4127_v52 = vadd.f32 %v2126_v46, %v993_v47  ;;  %v2061_v53 = vadd.f32 %v2060_v51, %v2059_v48  ;;  %v2128_v54 = vpop.f32.mrb[29].mxu1 }
 0x163   : > { %v2129_v55 = vadd.f32 %v2128_v54, %v2127_v49 }
 0x164   : > { %v998_v15 = vadd.f32 %v2061_v53, %v4103_v29  ;;  %v2062_v56 = vpop.f32.mrb[30].mxu0 }
 0x165   : > { %v2130_v58 = vpop.f32.mrb[30].mxu1  ;;  %v2063_v59 = vpop.f32.mrb[31].mxu0 }
 0x166   : > { %v4130_v60 = vadd.f32 %v2129_v55, %v998_v15  ;;  %v2064_v61 = vadd.f32 %v2063_v59, %v2062_v56  ;;  %v2131_v62 = vpop.f32.mrb[31].mxu1 }
 0x167   : > { %v2132_v63 = vadd.f32 %v2131_v62, %v2130_v58 }
 0x168   : > { %v1003_v22 = vadd.f32 %v2064_v61, %v4105_v36  ;;  %v2065_v1 = vpop.f32.mrb[32].mxu0 }
 0x169   : > { %v2133_v2 = vpop.f32.mrb[32].mxu1  ;;  %v2066_v3 = vpop.f32.mrb[33].mxu0 }
 0x16a   : > { %v4133_v4 = vadd.f32 %v2132_v63, %v1003_v22  ;;  %v2067_v5 = vadd.f32 %v2066_v3, %v2065_v1  ;;  %v2134_v6 = vpop.f32.mrb[33].mxu1 }
 0x16b   : > { %v2135_v8 = vadd.f32 %v2134_v6, %v2133_v2 }
 0x16c   : > { %v1008_v29 = vadd.f32 %v2067_v5, %v4107_v43  ;;  %v2068_v9 = vpop.f32.mrb[34].mxu0 }
 0x16d   : > { %v2136_v10 = vpop.f32.mrb[34].mxu1  ;;  %v2069_v11 = vpop.f32.mrb[35].mxu0 }
 0x16e   : > { %v4136_v12 = vadd.f32 %v2135_v8, %v1008_v29  ;;  %v2070_v13 = vadd.f32 %v2069_v11, %v2068_v9  ;;  %v2137_v16 = vpop.f32.mrb[35].mxu1 }
 0x16f   : > { %v2138_v17 = vadd.f32 %v2137_v16, %v2136_v10 }
 0x170   : > { %v1013_v36 = vadd.f32 %v2070_v13, %v4109_v50  ;;  %v2071_v18 = vpop.f32.mrb[36].mxu0 }
 0x171   : > { %v2139_v19 = vpop.f32.mrb[36].mxu1  ;;  %v2072_v20 = vpop.f32.mrb[37].mxu0 }
 0x172   : > { %v4139_v21 = vadd.f32 %v2138_v17, %v1013_v36  ;;  %v2073_v24 = vadd.f32 %v2072_v20, %v2071_v18  ;;  %v2140_v25 = vpop.f32.mrb[37].mxu1 }
 0x173   : > { %v2141_v26 = vadd.f32 %v2140_v25, %v2139_v19 }
 0x174   : > { %v1018_v43 = vadd.f32 %v2073_v24, %v4111_v57  ;;  %v2074_v27 = vpop.f32.mrb[38].mxu0 }
 0x175   : > { %v2142_v28 = vpop.f32.mrb[38].mxu1  ;;  %v2075_v30 = vpop.f32.mrb[39].mxu0 }
 0x176   : > { %v4142_v32 = vadd.f32 %v2141_v26, %v1018_v43  ;;  %v2076_v33 = vadd.f32 %v2075_v30, %v2074_v27  ;;  %v2143_v34 = vpop.f32.mrb[39].mxu1 }
 0x177   : > { %v2144_v35 = vadd.f32 %v2143_v34, %v2142_v28 }
 0x178   : > { %v1023_v50 = vadd.f32 %v2076_v33, %v4113_v0  ;;  %v2077_v37 = vpop.f32.mrb[40].mxu0 }
 0x179   : > { %v2145_v38 = vpop.f32.mrb[40].mxu1  ;;  %v2078_v39 = vpop.f32.mrb[41].mxu0 }
 0x17a   : > { %v4145_v40 = vadd.f32 %v2144_v35, %v1023_v50  ;;  %v2079_v41 = vadd.f32 %v2078_v39, %v2077_v37  ;;  %v2146_v44 = vpop.f32.mrb[41].mxu1 }
 0x17b   : > { %v2147_v45 = vadd.f32 %v2146_v44, %v2145_v38 }
 0x17c   : > { %v1028_v57 = vadd.f32 %v2079_v41, %v4115_v7  ;;  %v2080_v46 = vpop.f32.mrb[42].mxu0 }
 0x17d   : > { %v2148_v47 = vpop.f32.mrb[42].mxu1  ;;  %v2081_v48 = vpop.f32.mrb[43].mxu0 }
 0x17e   : > { %v4148_v49 = vadd.f32 %v2147_v45, %v1028_v57  ;;  %v2082_v51 = vadd.f32 %v2081_v48, %v2080_v46  ;;  %v2149_v53 = vpop.f32.mrb[43].mxu1 }
 0x17f   : > { %v2150_v54 = vadd.f32 %v2149_v53, %v2148_v47 }
 0x180   : > { %v1033_v0 = vadd.f32 %v2082_v51, %v4117_v14  ;;  %v2083_v55 = vpop.f32.mrb[44].mxu0 }
 0x181   : > { %v2151_v15 = vpop.f32.mrb[44].mxu1  ;;  %v2084_v56 = vpop.f32.mrb[45].mxu0 }
 0x182   : > { %v4151_v58 = vadd.f32 %v2150_v54, %v1033_v0  ;;  %v2085_v59 = vadd.f32 %v2084_v56, %v2083_v55  ;;  %v2152_v61 = vpop.f32.mrb[45].mxu1 }
 0x183   : > { %v2153_v62 = vadd.f32 %v2152_v61, %v2151_v15 }
 0x184   : > { %v1038_v7 = vadd.f32 %v2085_v59, %v4119_v23  ;;  %v2086_v63 = vpop.f32.mrb[46].mxu0 }
 0x185   : > { %v2154_v22 = vpop.f32.mrb[46].mxu1  ;;  %v2087_v1 = vpop.f32.mrb[47].mxu0 }
 0x186   : > { %v4154_v2 = vadd.f32 %v2153_v62, %v1038_v7  ;;  %v2088_v3 = vadd.f32 %v2087_v1, %v2086_v63  ;;  %v2155_v5 = vpop.f32.mrb[47].mxu1 }
 0x187   : > { %v2156_v6 = vadd.f32 %v2155_v5, %v2154_v22 }
 0x188   : > { %v1043_v14 = vadd.f32 %v2088_v3, %v4121_v31  ;;  %v2189_v8 = vpop.f32.mrb[48].mxu0 }
 0x189   : > { %v2257_v29 = vpop.f32.mrb[48].mxu1  ;;  %v2190_v9 = vpop.f32.mrb[49].mxu0 }
 0x18a   : > { %v4157_v10 = vadd.f32 %v2156_v6, %v1043_v14  ;;  %v2191_v11 = vadd.f32 %v2190_v9, %v2189_v8  ;;  %v2258_v13 = vpop.f32.mrb[49].mxu1 }
 0x18b   : > { %v2259_v16 = vadd.f32 %v2258_v13, %v2257_v29 }
 0x18c   : > { %v1238_v23 = vadd.f32 %v2191_v11, %v4124_v42  ;;  %v2192_v17 = vpop.f32.mrb[50].mxu0 }
 0x18d   : > { %v2260_v36 = vpop.f32.mrb[50].mxu1  ;;  %v2193_v18 = vpop.f32.mrb[51].mxu0 }
 0x18e   : > { %v4160_v19 = vadd.f32 %v2259_v16, %v1238_v23  ;;  %v2194_v20 = vadd.f32 %v2193_v18, %v2192_v17  ;;  %v2261_v24 = vpop.f32.mrb[51].mxu1 }
 0x18f   : > { %v2262_v25 = vadd.f32 %v2261_v24, %v2260_v36 }
 0x190   : > { %v1243_v31 = vadd.f32 %v2194_v20, %v4127_v52  ;;  %v2195_v26 = vpop.f32.mrb[52].mxu0 }
 0x191   : > { %v2263_v43 = vpop.f32.mrb[52].mxu1  ;;  %v2196_v27 = vpop.f32.mrb[53].mxu0 }
 0x192   : > { %v4163_v28 = vadd.f32 %v2262_v25, %v1243_v31  ;;  %v2197_v30 = vadd.f32 %v2196_v27, %v2195_v26  ;;  %v2264_v33 = vpop.f32.mrb[53].mxu1 }
 0x193   : > { %v2265_v34 = vadd.f32 %v2264_v33, %v2263_v43 }
 0x194   : > { %v1248_v42 = vadd.f32 %v2197_v30, %v4130_v60  ;;  %v2198_v35 = vpop.f32.mrb[54].mxu0 }
 0x195   : > { %v2266_v50 = vpop.f32.mrb[54].mxu1  ;;  %v2199_v37 = vpop.f32.mrb[55].mxu0 }
 0x196   : > { %v4166_v38 = vadd.f32 %v2265_v34, %v1248_v42  ;;  %v2200_v39 = vadd.f32 %v2199_v37, %v2198_v35  ;;  %v2267_v41 = vpop.f32.mrb[55].mxu1 }
 0x197   : > { %v2268_v44 = vadd.f32 %v2267_v41, %v2266_v50 }
 0x198   : > { %v1253_v52 = vadd.f32 %v2200_v39, %v4133_v4  ;;  %v2201_v45 = vpop.f32.mrb[56].mxu0 }
 0x199   : > { %v2269_v57 = vpop.f32.mrb[56].mxu1  ;;  %v2202_v46 = vpop.f32.mrb[57].mxu0 }
 0x19a   : > { %v4169_v47 = vadd.f32 %v2268_v44, %v1253_v52  ;;  %v2203_v48 = vadd.f32 %v2202_v46, %v2201_v45  ;;  %v2270_v51 = vpop.f32.mrb[57].mxu1 }
 0x19b   : > { %v2271_v53 = vadd.f32 %v2270_v51, %v2269_v57 }
 0x19c   : > { %v1258_v60 = vadd.f32 %v2203_v48, %v4136_v12  ;;  %v2204_v54 = vpop.f32.mrb[58].mxu0 }
 0x19d   : > { %v2272_v0 = vpop.f32.mrb[58].mxu1  ;;  %v2205_v55 = vpop.f32.mrb[59].mxu0 }
 0x19e   : > { %v4172_v15 = vadd.f32 %v2271_v53, %v1258_v60  ;;  %v2206_v56 = vadd.f32 %v2205_v55, %v2204_v54  ;;  %v2273_v59 = vpop.f32.mrb[59].mxu1 }
 0x19f   : > { %v2274_v61 = vadd.f32 %v2273_v59, %v2272_v0 }
 0x1a0   : > { %v1263_v4 = vadd.f32 %v2206_v56, %v4139_v21  ;;  %v2207_v62 = vpop.f32.mrb[60].mxu0 }
 0x1a1   : > { %v2275_v7 = vpop.f32.mrb[60].mxu1  ;;  %v2208_v63 = vpop.f32.mrb[61].mxu0 }
 0x1a2   : > { %v4175_v22 = vadd.f32 %v2274_v61, %v1263_v4  ;;  %v2209_v1 = vadd.f32 %v2208_v63, %v2207_v62  ;;  %v2276_v3 = vpop.f32.mrb[61].mxu1 }
 0x1a3   : > { %v2277_v5 = vadd.f32 %v2276_v3, %v2275_v7 }
 0x1a4   : > { %v1268_v12 = vadd.f32 %v2209_v1, %v4142_v32  ;;  %v2210_v6 = vpop.f32.mrb[62].mxu0 }
 0x1a5   : > { %v2278_v14 = vpop.f32.mrb[62].mxu1  ;;  %v2211_v8 = vpop.f32.mrb[63].mxu0 }
 0x1a6   : > { %v4178_v29 = vadd.f32 %v2277_v5, %v1268_v12  ;;  %v2212_v9 = vadd.f32 %v2211_v8, %v2210_v6  ;;  %v2279_v11 = vpop.f32.mrb[63].mxu1 }
 0x1a7   : > { %v2280_v13 = vadd.f32 %v2279_v11, %v2278_v14 }
 0x1a8   : > { %v1273_v21 = vadd.f32 %v2212_v9, %v4145_v40  ;;  %v2213_v16 = vpop.f32.mrb[64].mxu0 }
 0x1a9   : > { %v2281_v23 = vpop.f32.mrb[64].mxu1  ;;  %v2214_v17 = vpop.f32.mrb[65].mxu0 }
 0x1aa   : > { %v4181_v36 = vadd.f32 %v2280_v13, %v1273_v21  ;;  %v2215_v18 = vadd.f32 %v2214_v17, %v2213_v16  ;;  %v2282_v20 = vpop.f32.mrb[65].mxu1 }
 0x1ab   : > { %v2283_v24 = vadd.f32 %v2282_v20, %v2281_v23 }
 0x1ac   : > { %v1278_v32 = vadd.f32 %v2215_v18, %v4148_v49  ;;  %v2216_v25 = vpop.f32.mrb[66].mxu0 }
 0x1ad   : > { %v2284_v31 = vpop.f32.mrb[66].mxu1  ;;  %v2217_v26 = vpop.f32.mrb[67].mxu0 }
 0x1ae   : > { %v4184_v43 = vadd.f32 %v2283_v24, %v1278_v32  ;;  %v2218_v27 = vadd.f32 %v2217_v26, %v2216_v25  ;;  %v2285_v30 = vpop.f32.mrb[67].mxu1 }
 0x1af   : > { %v2286_v33 = vadd.f32 %v2285_v30, %v2284_v31 }
 0x1b0   : > { %v1283_v40 = vadd.f32 %v2218_v27, %v4151_v58  ;;  %v2219_v34 = vpop.f32.mrb[68].mxu0 }
 0x1b1   : > { %v2287_v42 = vpop.f32.mrb[68].mxu1  ;;  %v2220_v35 = vpop.f32.mrb[69].mxu0 }
 0x1b2   : > { %v4187_v50 = vadd.f32 %v2286_v33, %v1283_v40  ;;  %v2221_v37 = vadd.f32 %v2220_v35, %v2219_v34  ;;  %v2288_v39 = vpop.f32.mrb[69].mxu1 }
 0x1b3   : > { %v2289_v41 = vadd.f32 %v2288_v39, %v2287_v42 }
 0x1b4   : > { %v1288_v49 = vadd.f32 %v2221_v37, %v4154_v2  ;;  %v2222_v44 = vpop.f32.mrb[70].mxu0 }
 0x1b5   : > { %v2290_v52 = vpop.f32.mrb[70].mxu1  ;;  %v2223_v45 = vpop.f32.mrb[71].mxu0 }
 0x1b6   : > { %v4190_v57 = vadd.f32 %v2289_v41, %v1288_v49  ;;  %v2224_v46 = vadd.f32 %v2223_v45, %v2222_v44  ;;  %v2291_v48 = vpop.f32.mrb[71].mxu1 }
 0x1b7   : > { %v2292_v51 = vadd.f32 %v2291_v48, %v2290_v52 }
 0x1b8   : > { %v1293_v58 = vadd.f32 %v2224_v46, %v4157_v10  ;;  %v2325_v53 = vpop.f32.mrb[72].mxu0 }
 0x1b9   : > { %v2393_v60 = vpop.f32.mrb[72].mxu1  ;;  %v2326_v54 = vpop.f32.mrb[73].mxu0 }
 0x1ba   : > { %v4193_v0 = vadd.f32 %v2292_v51, %v1293_v58  ;;  %v2327_v55 = vadd.f32 %v2326_v54, %v2325_v53  ;;  %v2394_v56 = vpop.f32.mrb[73].mxu1 }
 0x1bb   : > { %v2395_v59 = vadd.f32 %v2394_v56, %v2393_v60 }
 0x1bc   : > { %v1488_v2 = vadd.f32 %v2327_v55, %v4160_v19  ;;  %v2328_v61 = vpop.f32.mrb[74].mxu0 }
 0x1bd   : > { %v2396_v4 = vpop.f32.mrb[74].mxu1  ;;  %v2329_v62 = vpop.f32.mrb[75].mxu0 }
 0x1be   : > { %v4196_v7 = vadd.f32 %v2395_v59, %v1488_v2  ;;  %v2330_v63 = vadd.f32 %v2329_v62, %v2328_v61  ;;  %v2397_v1 = vpop.f32.mrb[75].mxu1 }
 0x1bf   : > { %v2398_v3 = vadd.f32 %v2397_v1, %v2396_v4 }
 0x1c0   : > { %v1493_v10 = vadd.f32 %v2330_v63, %v4163_v28  ;;  %v2331_v5 = vpop.f32.mrb[76].mxu0 }
 0x1c1   : > { %v2399_v12 = vpop.f32.mrb[76].mxu1  ;;  %v2332_v6 = vpop.f32.mrb[77].mxu0 }
 0x1c2   : > { %v4199_v14 = vadd.f32 %v2398_v3, %v1493_v10  ;;  %v2333_v8 = vadd.f32 %v2332_v6, %v2331_v5  ;;  %v2400_v9 = vpop.f32.mrb[77].mxu1 }
 0x1c3   : > { %v2401_v11 = vadd.f32 %v2400_v9, %v2399_v12 }
 0x1c4   : > { %v1498_v19 = vadd.f32 %v2333_v8, %v4166_v38  ;;  %v2334_v13 = vpop.f32.mrb[78].mxu0 }
 0x1c5   : > { %v2402_v21 = vpop.f32.mrb[78].mxu1  ;;  %v2335_v16 = vpop.f32.mrb[79].mxu0 }
 0x1c6   : > { %v4202_v23 = vadd.f32 %v2401_v11, %v1498_v19  ;;  %v2336_v17 = vadd.f32 %v2335_v16, %v2334_v13  ;;  %v2403_v18 = vpop.f32.mrb[79].mxu1 }
 0x1c7   : > { %v2404_v20 = vadd.f32 %v2403_v18, %v2402_v21 }
 0x1c8   : > { %v1503_v28 = vadd.f32 %v2336_v17, %v4169_v47  ;;  %v2337_v24 = vpop.f32.mrb[80].mxu0 }
 0x1c9   : > { %v2405_v32 = vpop.f32.mrb[80].mxu1  ;;  %v2338_v25 = vpop.f32.mrb[81].mxu0 }
 0x1ca   : > { %v4205_v31 = vadd.f32 %v2404_v20, %v1503_v28  ;;  %v2339_v26 = vadd.f32 %v2338_v25, %v2337_v24  ;;  %v2406_v27 = vpop.f32.mrb[81].mxu1 }
 0x1cb   : > { %v2407_v30 = vadd.f32 %v2406_v27, %v2405_v32 }
 0x1cc   : > { %v1508_v38 = vadd.f32 %v2339_v26, %v4172_v15  ;;  %v2340_v33 = vpop.f32.mrb[82].mxu0 }
 0x1cd   : > { %v2408_v40 = vpop.f32.mrb[82].mxu1  ;;  %v2341_v34 = vpop.f32.mrb[83].mxu0 }
 0x1ce   : > { %v4208_v42 = vadd.f32 %v2407_v30, %v1508_v38  ;;  %v2342_v35 = vadd.f32 %v2341_v34, %v2340_v33  ;;  %v2409_v37 = vpop.f32.mrb[83].mxu1 }
 0x1cf   : > { %v2410_v39 = vadd.f32 %v2409_v37, %v2408_v40 }
 0x1d0   : > { %v1513_v47 = vadd.f32 %v2342_v35, %v4175_v22  ;;  %v2343_v41 = vpop.f32.mrb[84].mxu0 }
 0x1d1   : > { %v2411_v49 = vpop.f32.mrb[84].mxu1  ;;  %v2344_v44 = vpop.f32.mrb[85].mxu0 }
 0x1d2   : > { %v4211_v52 = vadd.f32 %v2410_v39, %v1513_v47  ;;  %v2345_v45 = vadd.f32 %v2344_v44, %v2343_v41  ;;  %v2412_v46 = vpop.f32.mrb[85].mxu1 }
 0x1d3   : > { %v2413_v48 = vadd.f32 %v2412_v46, %v2411_v49 }
 0x1d4   : > { %v1518_v15 = vadd.f32 %v2345_v45, %v4178_v29  ;;  %v2346_v51 = vpop.f32.mrb[86].mxu0 }
 0x1d5   : > { %v2414_v58 = vpop.f32.mrb[86].mxu1  ;;  %v2347_v53 = vpop.f32.mrb[87].mxu0 }
 0x1d6   : > { %v1643_v60 = vadd.f32 %v2413_v48, %v1518_v15  ;;  %v2348_v54 = vadd.f32 %v2347_v53, %v2346_v51  ;;  %v2415_v55 = vpop.f32.mrb[87].mxu1 }
 0x1d7   : > { %v2416_v56 = vadd.f32 %v2415_v55, %v2414_v58 }
 0x1d8   : > { %v1523_v22 = vadd.f32 %v2348_v54, %v4181_v36  ;;  %v2349_v59 = vpop.f32.mrb[88].mxu0 }
 0x1d9   : > { %v2417_v2 = vpop.f32.mrb[88].mxu1  ;;  %v2350_v61 = vpop.f32.mrb[89].mxu0 }
 0x1da   : > { %v1648_v4 = vadd.f32 %v2416_v56, %v1523_v22  ;;  %v2351_v62 = vadd.f32 %v2350_v61, %v2349_v59  ;;  %v2418_v63 = vpop.f32.mrb[89].mxu1 }
 0x1db   : > { %v2419_v1 = vadd.f32 %v2418_v63, %v2417_v2 }
 0x1dc   : > { %v1528_v3 = vadd.f32 %v2351_v62, %v4184_v43  ;;  %v2352_v29 = vpop.f32.mrb[90].mxu0 }
 0x1dd   : > { %v2420_v10 = vpop.f32.mrb[90].mxu1  ;;  %v2353_v5 = vpop.f32.mrb[91].mxu0 }
 0x1de   : > { %v1653_v12 = vadd.f32 %v2419_v1, %v1528_v3  ;;  %v2354_v6 = vadd.f32 %v2353_v5, %v2352_v29  ;;  %v2421_v8 = vpop.f32.mrb[91].mxu1 }
 0x1df   : > { %v2422_v9 = vadd.f32 %v2421_v8, %v2420_v10 }
 0x1e0   : > { %v1533_v36 = vadd.f32 %v2354_v6, %v4187_v50  ;;  %v2355_v11 = vpop.f32.mrb[92].mxu0 }
 0x1e1   : > { %v2423_v19 = vpop.f32.mrb[92].mxu1  ;;  %v2356_v13 = vpop.f32.mrb[93].mxu0 }
 0x1e2   : > { %v1658_v21 = vadd.f32 %v2422_v9, %v1533_v36  ;;  %v2357_v16 = vadd.f32 %v2356_v13, %v2355_v11  ;;  %v2424_v17 = vpop.f32.mrb[93].mxu1 }
 0x1e3   : > { %v2425_v18 = vadd.f32 %v2424_v17, %v2423_v19 }
 0x1e4   : > { %v1538_v43 = vadd.f32 %v2357_v16, %v4190_v57  ;;  %v2358_v20 = vpop.f32.mrb[94].mxu0 }
 0x1e5   : > { %v2426_v28 = vpop.f32.mrb[94].mxu1  ;;  %v2359_v24 = vpop.f32.mrb[95].mxu0 }
 0x1e6   : > { %v1663_v32 = vadd.f32 %v2425_v18, %v1538_v43  ;;  %v2360_v25 = vadd.f32 %v2359_v24, %v2358_v20  ;;  %v2427_v26 = vpop.f32.mrb[95].mxu1 }
 0x1e7   : > { %v2428_v27 = vadd.f32 %v2427_v26, %v2426_v28 }
 0x1e8   : > { %v1543_v50 = vadd.f32 %v2360_v25, %v4193_v0  ;;  %v2461_v30 = vpop.f32.mrb[96].mxu0 }
 0x1e9   : > { %v2479_v38 = vpop.f32.mrb[96].mxu1  ;;  %v2462_v33 = vpop.f32.mrb[97].mxu0 }
 0x1ea   : > { %v1668_v40 = vadd.f32 %v2428_v27, %v1543_v50  ;;  %v2463_v34 = vadd.f32 %v2462_v33, %v2461_v30  ;;  %v2480_v35 = vpop.f32.mrb[97].mxu1 }
 0x1eb   : > { %v2481_v57 = vadd.f32 %v2480_v35, %v2479_v38 }
 0x1ec   : > { %v1738_v37 = vadd.f32 %v2463_v34, %v4196_v7  ;;  %v2464_v0 = vpop.f32.mrb[98].mxu0 }
 0x1ed   : > { %v1768_v39 = vadd.f32 %v2481_v57, %v1643_v60  ;;  %v2482_v47 = vpop.f32.mrb[98].mxu1  ;;  %v2465_v41 = vpop.f32.mrb[99].mxu0 }
 0x1ee   : > { %1797 = vst.msk [vmem:[%s4224_s5] sm:$0xff] %vm1796_vm0, %v1738_v37  ;;  %v2466_v49 = vadd.f32 %v2465_v41, %v2464_v0  ;;  %v2483_v44 = vpop.f32.mrb[99].mxu1 }
 0x1ef   : > { %1803 = vst.msk [vmem:[%s4224_s5 + $0x30] sm:$0xff] %vm1796_vm0, %v1768_v39  ;;  %v2484_v45 = vadd.f32 %v2483_v44, %v2482_v47 }
 0x1f0   : > { %v1743_v46 = vadd.f32 %v2466_v49, %v4199_v14  ;;  %v2467_v48 = vpop.f32.mrb[100].mxu0 }
 0x1f1   : > { %v1773_v15 = vadd.f32 %v2484_v45, %v1648_v4  ;;  %v2485_v51 = vpop.f32.mrb[100].mxu1  ;;  %v2468_v7 = vpop.f32.mrb[101].mxu0 }
 0x1f2   : > { %1798 = vst.msk [vmem:[%s4224_s5 + $0x8] sm:$0xff] %vm1796_vm0, %v1743_v46  ;;  %v2469_v58 = vadd.f32 %v2468_v7, %v2467_v48  ;;  %v2486_v53 = vpop.f32.mrb[101].mxu1 }
 0x1f3   : > { %1804 = vst.msk [vmem:[%s4224_s5 + $0x38] sm:$0xff] %vm1796_vm0, %v1773_v15  ;;  %v2487_v60 = vadd.f32 %v2486_v53, %v2485_v51 }
 0x1f4   : > { %v1748_v54 = vadd.f32 %v2469_v58, %v4202_v23  ;;  %v2470_v55 = vpop.f32.mrb[102].mxu0 }
 0x1f5   : > { %v1778_v56 = vadd.f32 %v2487_v60, %v1653_v12  ;;  %v2488_v22 = vpop.f32.mrb[102].mxu1  ;;  %v2471_v14 = vpop.f32.mrb[103].mxu0 }
 0x1f6   : > { %1799 = vst.msk [vmem:[%s4224_s5 + $0x10] sm:$0xff] %vm1796_vm0, %v1748_v54  ;;  %v2472_v59 = vadd.f32 %v2471_v14, %v2470_v55  ;;  %v2489_v2 = vpop.f32.mrb[103].mxu1 }
 0x1f7   : > { %1805 = vst.msk [vmem:[%s4224_s5 + $0x40] sm:$0xff] %vm1796_vm0, %v1778_v56  ;;  %v2490_v61 = vadd.f32 %v2489_v2, %v2488_v22 }
 0x1f8   : > { %v1753_v4 = vadd.f32 %v2472_v59, %v4205_v31  ;;  %v2473_v62 = vpop.f32.mrb[104].mxu0 }
 0x1f9   : > { %v1783_v63 = vadd.f32 %v2490_v61, %v1658_v21  ;;  %v2491_v1 = vpop.f32.mrb[104].mxu1  ;;  %v2474_v23 = vpop.f32.mrb[105].mxu0 }
 0x1fa   : > { %1800 = vst.msk [vmem:[%s4224_s5 + $0x18] sm:$0xff] %vm1796_vm0, %v1753_v4  ;;  %v2475_v3 = vadd.f32 %v2474_v23, %v2473_v62  ;;  %v2492_v29 = vpop.f32.mrb[105].mxu1 }
 0x1fb   : > { %1806 = vst.msk [vmem:[%s4224_s5 + $0x48] sm:$0xff] %vm1796_vm0, %v1783_v63  ;;  %v2493_v10 = vadd.f32 %v2492_v29, %v2491_v1 }
 0x1fc   : > { %v1758_v5 = vadd.f32 %v2475_v3, %v4208_v42  ;;  %v2476_v12 = vpop.f32.mrb[106].mxu0 }
 0x1fd   : > { %v1788_v6 = vadd.f32 %v2493_v10, %v1663_v32  ;;  %v2494_v8 = vpop.f32.mrb[106].mxu1  ;;  %v2477_v31 = vpop.f32.mrb[107].mxu0 }
 0x1fe   : > { %1801 = vst.msk [vmem:[%s4224_s5 + $0x20] sm:$0xff] %vm1796_vm0, %v1758_v5  ;;  %v2478_v9 = vadd.f32 %v2477_v31, %v2476_v12  ;;  %v2495_v36 = vpop.f32.mrb[107].mxu1 }
 0x1ff   : > { %1807 = vst.msk [vmem:[%s4224_s5 + $0x50] sm:$0xff] %vm1796_vm0, %v1788_v6  ;;  %v2496_v11 = vadd.f32 %v2495_v36, %v2494_v8 }
 0x200   : > { %v1763_v19 = vadd.f32 %v2478_v9, %v4211_v52 }
 0x201   : > { %v1793_v13 = vadd.f32 %v2496_v11, %v1668_v40 }
 0x202   : > { %1802 = vst.msk [vmem:[%s4224_s5 + $0x28] sm:$0xff] %vm1796_vm0, %v1763_v19 }
 0x203   : > { %1808 = vst.msk [vmem:[%s4224_s5 + $0x58] sm:$0xff] %vm1796_vm0, %v1793_v13 }
 0x204 PF: > { %p12_p8 = scmp.ge.s32.totalorder %s2950_s14, 6   ;;  %s4274_s9 = smov %s2902_s10 }
 0x205   : > { %s4275_s10 = smov %s2906_s11  ;;  %s4276_s11 = smov %s2960_s17 }
 0x206   : > { %s4277_s12 = smov %s2950_s14  ;;  %14 = sbr.rel (!%p12_p8) target bundleno = 3 (0x3), region = 68 }
 0x20d   :  { %1831 = vsyncpa [#allocation3], 1 }
 0x20e   :  { %1833 = vsyncpa [#allocation3 + $0x1], 1 }

</bundles_post_ra>
